<compile_context>
chip_gen: v7x
topology: tpu7x:2x2x1
jax: 0.10.0
libtpu: 0.0.40
codegen_flags: <defaults>
</compile_context>

<pallas_src>
import functools
import math

import numpy as np
import jax
import jax.numpy as jnp
from jax.experimental import pallas as pl
from jax.experimental.pallas import tpu as pltpu


# -----------------------------------------------------------------------------
# Deterministic parameter init: reproduce
#   n = zeros((k, k)); n[p, p] = 1; k = scipy.ndimage.gaussian_filter(n, sigma)
# without scipy. gaussian_filter is separable with reflect ('symmetric')
# boundary, so filtering the 2-D delta gives outer(y, y) with y the filtered
# 1-D delta.  We only need y (the 1-D taps) for the separable kernel.
# -----------------------------------------------------------------------------
def gaussian_weight_1d(sigma: float) -> np.ndarray:
    padding = math.ceil(sigma)
    ksize = 2 * padding + 1
    truncate = 4.0
    radius = int(truncate * float(sigma) + 0.5)
    x = np.arange(-radius, radius + 1, dtype=np.float64)
    w = np.exp(-0.5 * (x / float(sigma)) ** 2)
    w = w / w.sum()
    # 1-D delta of length ksize filtered with scipy's 'reflect' boundary
    # (== np.pad mode='symmetric').
    d = np.zeros(ksize, dtype=np.float64)
    d[padding] = 1.0
    d_ext = np.pad(d, radius, mode="symmetric")
    y = np.array(
        [np.dot(w, d_ext[i : i + 2 * radius + 1]) for i in range(ksize)]
    )
    return y  # 2-D conv weight == np.outer(y, y)


# -----------------------------------------------------------------------------
# Pallas kernel: one (H, W, BB) channels-last block per grid step.
#  - Reflection pad along H via row copies on the untiled leading dim.
#  - Vertical 1-D pass (7 taps, leading-dim slices -> no lane/sublane shifts).
#  - Reflection pad along W via column copies on the sublane dim.
#  - Horizontal 1-D pass (7 taps, sublane-shifted slices).
# Weights arrive as compile-time Python float immediates; accumulation in f32.
# -----------------------------------------------------------------------------
def _gauss_separable_kernel(x_ref, o_ref, *, taps, p, H, W):
    # Single upfront cast (hoisted out of the MAC loops; matters for bf16 in).
    x = x_ref[...].astype(jnp.float32)  # (H, W, BB)

    # --- reflect pad along H (leading, untiled dim) ---------------------------
    top = [x[p - i : p - i + 1] for i in range(p)]            # rows p, ..., 1
    bot = [x[H - 2 - i : H - 1 - i] for i in range(p)]        # rows H-2, ..., H-1-p
    xp = jnp.concatenate(top + [x] + bot, axis=0)             # (H+2p, W, BB)

    # --- vertical 1-D pass: slices along the untiled leading dim --------------
    t = taps[0] * xp[0:H]
    for u in range(1, len(taps)):
        t = t + taps[u] * xp[u : u + H]                       # (H, W, BB)

    # --- reflect pad along W (sublane dim) ------------------------------------
    left = [t[:, p - i : p - i + 1, :] for i in range(p)]     # cols p, ..., 1
    right = [t[:, W - 2 - i : W - 1 - i, :] for i in range(p)]
    tp = jnp.concatenate(left + [t] + right, axis=1)          # (H, W+2p, BB)

    # --- horizontal 1-D pass: sublane-shifted slices ---------------------------
    acc = taps[0] * tp[:, 0:W, :]
    for v in range(1, len(taps)):
        acc = acc + taps[v] * tp[:, v : v + W, :]             # (H, W, BB)

    o_ref[...] = acc.astype(o_ref.dtype)


@functools.partial(jax.jit, static_argnames="sigma")
def gaussian_layer(x: jax.Array, sigma: float = 3.0) -> jax.Array:
    """Forward pass of GaussianLayer. x: (N, C, H, W)."""
    N, C, H, W = x.shape
    p = math.ceil(sigma)
    assert H > p and W > p, "reflection pad requires spatial dims > padding"

    taps = tuple(float(v) for v in gaussian_weight_1d(sigma))  # immediates

    B = N * C
    # Channels-last: put the flattened batch*channel dim on lanes.
    xt = jnp.transpose(x.reshape(B, H, W), (1, 2, 0))          # (H, W, B)

    # Lane-dense 128-wide chunks when possible (also gives >=2 parallel grid
    # steps for v7x's two TensorCores once B >= 256); otherwise one full-B
    # block so the whole problem is a single large block.
    BB = 128 if B % 128 == 0 else B
    grid = (B // BB,)

    # VMEM note (v7x: 64 MiB physical / 32 MiB default scoped): per block we
    # hold ~5x H*W*BB f32 (input, H-padded, intermediate, W-padded, acc) plus
    # double-buffered in/out blocks -- fine at these scales.
    # TODO(synk): tile H (with a p-row halo + per-block reflect handling) for
    # very large spatial extents where a full (H, W, BB) block would not fit
    # in VMEM.
    kernel = functools.partial(_gauss_separable_kernel, taps=taps, p=p, H=H, W=W)

    out_t = pl.pallas_call(
        kernel,
        out_shape=jax.ShapeDtypeStruct((H, W, B), x.dtype),
        grid=grid,
        in_specs=[pl.BlockSpec((H, W, BB), lambda b: (0, 0, b))],
        out_specs=pl.BlockSpec((H, W, BB), lambda b: (0, 0, b)),
        compiler_params=pltpu.CompilerParams(dimension_semantics=("parallel",)),
    )(xt)

    return jnp.transpose(out_t, (2, 0, 1)).reshape(N, C, H, W)


# -----------------------------------------------------------------------------
# Plain-JAX reference: direct (non-separable) 49-tap depthwise conv on a
# jnp.pad 'reflect' padded input, with the full 2-D weight outer(y, y).
# -----------------------------------------------------------------------------
def gaussian_layer_ref(x: jax.Array, sigma: float = 3.0) -> jax.Array:
    N, C, H, W = x.shape
    p = math.ceil(sigma)
    k = 2 * p + 1
    y = gaussian_weight_1d(sigma)
    weight = np.outer(y, y).astype(np.float32)
    xpad = jnp.pad(
        x, ((0, 0), (0, 0), (p, p), (p, p)), mode="reflect"
    ).astype(jnp.float32)
    acc = jnp.zeros((N, C, H, W), dtype=jnp.float32)
    for u in range(k):
        for v in range(k):
            acc = acc + weight[u, v] * xpad[:, :, u : u + H, v : v + W]
    return acc.astype(x.dtype)


if __name__ == "__main__":
    key = jax.random.PRNGKey(0)
    # Module defaults: sigma=3, channels=3. Small spatial size 16.
    N, C, H, W = 2, 3, 16, 16
    x = jax.random.normal(key, (N, C, H, W), dtype=jnp.float32)

    out = jax.block_until_ready(gaussian_layer(x, sigma=3.0))
    ref = jax.block_until_ready(gaussian_layer_ref(x, sigma=3.0))
    np.testing.assert_allclose(np.asarray(out), np.asarray(ref), rtol=1e-5, atol=1e-5)

    print("KERNEL_OK")
</pallas_src>

<mosaic_0001>
module attributes {stable_mosaic.version = 11 : i64} {
  func.func @_gauss_separable_kernel(%arg0: i32, %arg1: memref<16x16x6xf32, #tpu.memory_space<vmem>>, %arg2: memref<16x16x6xf32, #tpu.memory_space<vmem>>) attributes {dimension_semantics = [#tpu.dimension_semantics<parallel>], iteration_bounds = array<i64: 1>, scalar_prefetch = 0 : i64, scratch_operands = 0 : i64, tpu.core_type = #tpu.core_type<tc>, window_params = [{transform_indices = @transform_0, window_bounds = array<i64: 16, 16, 6>}, {transform_indices = @transform_1, window_bounds = array<i64: 16, 16, 6>}]} {
    %c0 = arith.constant 0 : index
    %c0_0 = arith.constant 0 : index
    %c0_1 = arith.constant 0 : index
    %0 = vector.load %arg1[%c0, %c0_0, %c0_1] : memref<16x16x6xf32, #tpu.memory_space<vmem>>, vector<16x16x6xf32>
    %1 = vector.extract_strided_slice %0 {offsets = [3, 0, 0], sizes = [1, 16, 6], strides = [1, 1, 1]} : vector<16x16x6xf32> to vector<1x16x6xf32>
    %2 = vector.extract_strided_slice %0 {offsets = [2, 0, 0], sizes = [1, 16, 6], strides = [1, 1, 1]} : vector<16x16x6xf32> to vector<1x16x6xf32>
    %3 = vector.extract_strided_slice %0 {offsets = [1, 0, 0], sizes = [1, 16, 6], strides = [1, 1, 1]} : vector<16x16x6xf32> to vector<1x16x6xf32>
    %4 = vector.extract_strided_slice %0 {offsets = [14, 0, 0], sizes = [1, 16, 6], strides = [1, 1, 1]} : vector<16x16x6xf32> to vector<1x16x6xf32>
    %5 = vector.extract_strided_slice %0 {offsets = [13, 0, 0], sizes = [1, 16, 6], strides = [1, 1, 1]} : vector<16x16x6xf32> to vector<1x16x6xf32>
    %6 = vector.extract_strided_slice %0 {offsets = [12, 0, 0], sizes = [1, 16, 6], strides = [1, 1, 1]} : vector<16x16x6xf32> to vector<1x16x6xf32>
    %7 = tpu.concatenate %1, %2, %3, %0, %4, %5, %6 in 0 : vector<1x16x6xf32>, vector<1x16x6xf32>, vector<1x16x6xf32>, vector<16x16x6xf32>, vector<1x16x6xf32>, vector<1x16x6xf32>, vector<1x16x6xf32> -> vector<22x16x6xf32>
    %8 = vector.extract_strided_slice %7 {offsets = [0, 0, 0], sizes = [16, 16, 6], strides = [1, 1, 1]} : vector<22x16x6xf32> to vector<16x16x6xf32>
    %cst = arith.constant 0.136004984 : f32
    %9 = vector.broadcast %cst : f32 to vector<16x16x6xf32>
    %10 = arith.mulf %9, %8 : vector<16x16x6xf32>
    %11 = vector.extract_strided_slice %7 {offsets = [1, 0, 0], sizes = [16, 16, 6], strides = [1, 1, 1]} : vector<22x16x6xf32> to vector<16x16x6xf32>
    %cst_2 = arith.constant 0.141167626 : f32
    %12 = vector.broadcast %cst_2 : f32 to vector<16x16x6xf32>
    %13 = arith.mulf %12, %11 : vector<16x16x6xf32>
    %14 = arith.addf %10, %13 : vector<16x16x6xf32>
    %15 = vector.extract_strided_slice %7 {offsets = [2, 0, 0], sizes = [16, 16, 6], strides = [1, 1, 1]} : vector<22x16x6xf32> to vector<16x16x6xf32>
    %cst_3 = arith.constant 0.147594258 : f32
    %16 = vector.broadcast %cst_3 : f32 to vector<16x16x6xf32>
    %17 = arith.mulf %16, %15 : vector<16x16x6xf32>
    %18 = arith.addf %14, %17 : vector<16x16x6xf32>
    %19 = vector.extract_strided_slice %7 {offsets = [3, 0, 0], sizes = [16, 16, 6], strides = [1, 1, 1]} : vector<22x16x6xf32> to vector<16x16x6xf32>
    %cst_4 = arith.constant 0.150466293 : f32
    %20 = vector.broadcast %cst_4 : f32 to vector<16x16x6xf32>
    %21 = arith.mulf %20, %19 : vector<16x16x6xf32>
    %22 = arith.addf %18, %21 : vector<16x16x6xf32>
    %23 = vector.extract_strided_slice %7 {offsets = [4, 0, 0], sizes = [16, 16, 6], strides = [1, 1, 1]} : vector<22x16x6xf32> to vector<16x16x6xf32>
    %cst_5 = arith.constant 0.147594258 : f32
    %24 = vector.broadcast %cst_5 : f32 to vector<16x16x6xf32>
    %25 = arith.mulf %24, %23 : vector<16x16x6xf32>
    %26 = arith.addf %22, %25 : vector<16x16x6xf32>
    %27 = vector.extract_strided_slice %7 {offsets = [5, 0, 0], sizes = [16, 16, 6], strides = [1, 1, 1]} : vector<22x16x6xf32> to vector<16x16x6xf32>
    %cst_6 = arith.constant 0.141167626 : f32
    %28 = vector.broadcast %cst_6 : f32 to vector<16x16x6xf32>
    %29 = arith.mulf %28, %27 : vector<16x16x6xf32>
    %30 = arith.addf %26, %29 : vector<16x16x6xf32>
    %31 = vector.extract_strided_slice %7 {offsets = [6, 0, 0], sizes = [16, 16, 6], strides = [1, 1, 1]} : vector<22x16x6xf32> to vector<16x16x6xf32>
    %cst_7 = arith.constant 0.136004984 : f32
    %32 = vector.broadcast %cst_7 : f32 to vector<16x16x6xf32>
    %33 = arith.mulf %32, %31 : vector<16x16x6xf32>
    %34 = arith.addf %30, %33 : vector<16x16x6xf32>
    %35 = vector.extract_strided_slice %34 {offsets = [0, 3, 0], sizes = [16, 1, 6], strides = [1, 1, 1]} : vector<16x16x6xf32> to vector<16x1x6xf32>
    %36 = vector.extract_strided_slice %34 {offsets = [0, 2, 0], sizes = [16, 1, 6], strides = [1, 1, 1]} : vector<16x16x6xf32> to vector<16x1x6xf32>
    %37 = vector.extract_strided_slice %34 {offsets = [0, 1, 0], sizes = [16, 1, 6], strides = [1, 1, 1]} : vector<16x16x6xf32> to vector<16x1x6xf32>
    %38 = vector.extract_strided_slice %34 {offsets = [0, 14, 0], sizes = [16, 1, 6], strides = [1, 1, 1]} : vector<16x16x6xf32> to vector<16x1x6xf32>
    %39 = vector.extract_strided_slice %34 {offsets = [0, 13, 0], sizes = [16, 1, 6], strides = [1, 1, 1]} : vector<16x16x6xf32> to vector<16x1x6xf32>
    %40 = vector.extract_strided_slice %34 {offsets = [0, 12, 0], sizes = [16, 1, 6], strides = [1, 1, 1]} : vector<16x16x6xf32> to vector<16x1x6xf32>
    %41 = tpu.concatenate %35, %36, %37, %34, %38, %39, %40 in 1 : vector<16x1x6xf32>, vector<16x1x6xf32>, vector<16x1x6xf32>, vector<16x16x6xf32>, vector<16x1x6xf32>, vector<16x1x6xf32>, vector<16x1x6xf32> -> vector<16x22x6xf32>
    %42 = vector.extract_strided_slice %41 {offsets = [0, 0, 0], sizes = [16, 16, 6], strides = [1, 1, 1]} : vector<16x22x6xf32> to vector<16x16x6xf32>
    %cst_8 = arith.constant 0.136004984 : f32
    %43 = vector.broadcast %cst_8 : f32 to vector<16x16x6xf32>
    %44 = arith.mulf %43, %42 : vector<16x16x6xf32>
    %45 = vector.extract_strided_slice %41 {offsets = [0, 1, 0], sizes = [16, 16, 6], strides = [1, 1, 1]} : vector<16x22x6xf32> to vector<16x16x6xf32>
    %cst_9 = arith.constant 0.141167626 : f32
    %46 = vector.broadcast %cst_9 : f32 to vector<16x16x6xf32>
    %47 = arith.mulf %46, %45 : vector<16x16x6xf32>
    %48 = arith.addf %44, %47 : vector<16x16x6xf32>
    %49 = vector.extract_strided_slice %41 {offsets = [0, 2, 0], sizes = [16, 16, 6], strides = [1, 1, 1]} : vector<16x22x6xf32> to vector<16x16x6xf32>
    %cst_10 = arith.constant 0.147594258 : f32
    %50 = vector.broadcast %cst_10 : f32 to vector<16x16x6xf32>
    %51 = arith.mulf %50, %49 : vector<16x16x6xf32>
    %52 = arith.addf %48, %51 : vector<16x16x6xf32>
    %53 = vector.extract_strided_slice %41 {offsets = [0, 3, 0], sizes = [16, 16, 6], strides = [1, 1, 1]} : vector<16x22x6xf32> to vector<16x16x6xf32>
    %cst_11 = arith.constant 0.150466293 : f32
    %54 = vector.broadcast %cst_11 : f32 to vector<16x16x6xf32>
    %55 = arith.mulf %54, %53 : vector<16x16x6xf32>
    %56 = arith.addf %52, %55 : vector<16x16x6xf32>
    %57 = vector.extract_strided_slice %41 {offsets = [0, 4, 0], sizes = [16, 16, 6], strides = [1, 1, 1]} : vector<16x22x6xf32> to vector<16x16x6xf32>
    %cst_12 = arith.constant 0.147594258 : f32
    %58 = vector.broadcast %cst_12 : f32 to vector<16x16x6xf32>
    %59 = arith.mulf %58, %57 : vector<16x16x6xf32>
    %60 = arith.addf %56, %59 : vector<16x16x6xf32>
    %61 = vector.extract_strided_slice %41 {offsets = [0, 5, 0], sizes = [16, 16, 6], strides = [1, 1, 1]} : vector<16x22x6xf32> to vector<16x16x6xf32>
    %cst_13 = arith.constant 0.141167626 : f32
    %62 = vector.broadcast %cst_13 : f32 to vector<16x16x6xf32>
    %63 = arith.mulf %62, %61 : vector<16x16x6xf32>
    %64 = arith.addf %60, %63 : vector<16x16x6xf32>
    %65 = vector.extract_strided_slice %41 {offsets = [0, 6, 0], sizes = [16, 16, 6], strides = [1, 1, 1]} : vector<16x22x6xf32> to vector<16x16x6xf32>
    %cst_14 = arith.constant 0.136004984 : f32
    %66 = vector.broadcast %cst_14 : f32 to vector<16x16x6xf32>
    %67 = arith.mulf %66, %65 : vector<16x16x6xf32>
    %68 = arith.addf %64, %67 : vector<16x16x6xf32>
    %c0_15 = arith.constant 0 : index
    %c0_16 = arith.constant 0 : index
    %c0_17 = arith.constant 0 : index
    %69 = vector.load %arg2[%c0_15, %c0_16, %c0_17] : memref<16x16x6xf32, #tpu.memory_space<vmem>>, vector<16x16x6xf32>
    tpu.vector_store %arg2[%c0_15, %c0_16, %c0_17], %68 {strides = array<i32>} : memref<16x16x6xf32, #tpu.memory_space<vmem>>, vector<16x16x6xf32>,
    return
  }
  func.func @transform_0(%arg0: i32) -> (i32, i32, i32) {
    %c0_i32 = arith.constant 0 : i32
    %c0_i32_0 = arith.constant 0 : i32
    %c0_i32_1 = arith.constant 0 : i32
    return %c0_i32, %c0_i32_0, %arg0 : i32, i32, i32
  }
  func.func @transform_1(%arg0: i32) -> (i32, i32, i32) {
    %c0_i32 = arith.constant 0 : i32
    %c0_i32_0 = arith.constant 0 : i32
    %c0_i32_1 = arith.constant 0 : i32
    return %c0_i32, %c0_i32_0, %arg0 : i32, i32, i32
  }
}

</mosaic_0001>

<bundles_post_ra>
// kernel: gaussian_layer.1
= control target key start
LH: loop header
LB: loop body
LE: loop exit
PB: predicated region body
PF: predicated region fallthrough
CT: control target
= control target key end

     0   :  { %vm681_vm0 = vcmask 1040384   ;;  %vm488_vm1 = vcmask 1042432   ;;  %vm698_vm2 = vcmask 1041408   ;;  %vm747_vm3 = vcmask 1043456   ;;  %s3266_s0 = inlined_call_operand.vmem [shape: f32[16,16,6], index: 0, kind: input, shape index: {}]   ;;  %s3267_s1 = inlined_call_operand.vmem [shape: f32[16,16,6], index: 1, kind: output, shape index: {}]  }
   0x1   :  { %v2086_v0 = vld [vmem:[%s3266_s0 + $0x10] sm:$0xff]  ;;  %v2091_v1 = vld [vmem:[%s3266_s0 + $0x18] sm:$0xff]  ;;  %v2096_v2 = vld [vmem:[%s3266_s0 + $0x20] sm:$0xff]  ;;  %vm764_vm4 = vcmask 1044480   ;;  %vm909_vm5 = vcmask 1046528   ;;  %vm1150_vm6 = vcmask 1045504  }
   0x2   :  { %v2101_v3 = vld [vmem:[%s3266_s0 + $0x28] sm:$0xff]  ;;  %v2104_v4 = vmul.f32 0.14759426, %v2086_v0  ;;  %v2109_v5 = vld [vmem:[%s3266_s0] sm:$0xff]  ;;  %v2114_v6 = vld [vmem:[%s3266_s0 + $0x30] sm:$0xff]  ;;  %vm2031_vm7 = vcmask 48128  }
   0x3   :  { %v2119_v7 = vld [vmem:[%s3266_s0 + $0x38] sm:$0xff]  ;;  %v2122_v8 = vmul.f32 0.14116763, %v2096_v2  ;;  %v2125_v9 = vmul.f32 0.14116763, %v2101_v3  ;;  %v2139_v13 = vld [vmem:[%s3266_s0 + $0x8] sm:$0xff] }
   0x4   :  { %v2128_v10 = vmul.f32 0.13600498, %v2114_v6  ;;  %v2131_v11 = vmul.f32 0.13600498, %v2119_v7  ;;  %v2134_v12 = vmul.f32 0.14759426, %v2091_v1 }
   0x5   :  { %v2144_v14 = vld [vmem:[%s3266_s0 + $0x40] sm:$0xff]  ;;  %v2149_v15 = vld [vmem:[%s3266_s0 + $0x48] sm:$0xff]  ;;  %v188_v18 = vmul.f32 0.1504663, %v2109_v5  ;;  %v189_v19 = vmul.f32 0.1504663, %v2139_v13 }
   0x6   :  { %v94_v16 = vadd.f32 %v2122_v8, %v2128_v10  ;;  %v95_v17 = vadd.f32 %v2125_v9, %v2131_v11  ;;  %v2160_v20 = vld [vmem:[%s3266_s0 + $0x50] sm:$0xff]  ;;  %v2165_v21 = vld [vmem:[%s3266_s0 + $0x58] sm:$0xff]  ;;  %v42_v22 = vmul.f32 0.13600498, %v2096_v2  ;;  %v43_v23 = vmul.f32 0.13600498, %v2101_v3 }
   0x7   :  { %v2170_v24 = vmul.f32 0.13600498, %v2144_v14  ;;  %v2175_v27 = vmul.f32 0.13600498, %v2149_v15  ;;  %v2178_v28 = vmul.f32 0.14116763, %v2086_v0 }
   0x8   :  { %v156_v25 = vadd.f32 %v2104_v4, %v94_v16  ;;  %v157_v26 = vadd.f32 %v2134_v12, %v95_v17  ;;  %v2181_v29 = vmul.f32 0.14116763, %v2091_v1  ;;  %v2184_v30 = vmul.f32 0.14116763, %v2114_v6  ;;  %v2208_v42 = vld [vmem:[%s3266_s0 + $0x60] sm:$0xff]  ;;  %v2221_v49 = vld [vmem:[%s3266_s0 + $0x68] sm:$0xff] }
   0x9   :  { %v2187_v31 = vmul.f32 0.14116763, %v2119_v7  ;;  %v2190_v34 = vmul.f32 0.14116763, %v2160_v20  ;;  %v2193_v35 = vmul.f32 0.14116763, %v2165_v21  ;;  %v96_v36 = vadd.f32 %v2178_v28, %v42_v22 }
   0xa   :  { %v220_v32 = vadd.f32 %v188_v18, %v156_v25  ;;  %v221_v33 = vadd.f32 %v189_v19, %v157_v26  ;;  %v2197_v37 = vadd.f32 %v2184_v30, %v42_v22  ;;  %v97_v41 = vadd.f32 %v2181_v29, %v43_v23 }
   0xb   :  { %v2200_v38 = vadd.f32 %v2187_v31, %v43_v23  ;;  %v108_v43 = vadd.f32 %v2190_v34, %v2170_v24  ;;  %v109_v44 = vadd.f32 %v2193_v35, %v2175_v27  ;;  %v128_v45 = vmul.f32 0.14759426, %v2109_v5 }
   0xc   :  { %v254_v39 = vadd.f32 %v220_v32, %v2104_v4  ;;  %v255_v40 = vadd.f32 %v221_v33, %v2134_v12  ;;  %v129_v46 = vmul.f32 0.14759426, %v2139_v13  ;;  %v2224_v50 = vmul.f32 0.14759426, %v2096_v2 }
   0xd   :  { %v2227_v51 = vmul.f32 0.14759426, %v2208_v42  ;;  %v2230_v52 = vmul.f32 0.14759426, %v2101_v3  ;;  %v2233_v53 = vmul.f32 0.14759426, %v2221_v49  ;;  %v158_v54 = vadd.f32 %v128_v45, %v96_v36 }
   0xe   :  { %v290_v47 = vadd.f32 %v254_v39, %v2122_v8  ;;  %v291_v48 = vadd.f32 %v255_v40, %v2125_v9  ;;  %v190_v55 = vmul.f32 0.1504663, %v2086_v0  ;;  %v159_v58 = vadd.f32 %v129_v46, %v97_v41 }
   0xf   :  { %3273 = vst [vmem:[#allocation2_spill] sm:$0xff] %v2227_v51  ;;  %3274 = vst [vmem:[#allocation3_spill] sm:$0xff] %v2233_v53  ;;  %v191_v59 = vmul.f32 0.1504663, %v2091_v1  ;;  %v2240_v60 = vadd.f32 %v2227_v51, %v108_v43  ;;  %v2243_v61 = vadd.f32 %v2233_v53, %v109_v44  ;;  %v2246_v63 = vmul.f32 0.13600498, %v2086_v0 }
  0x10   :  { %v328_v56 = vadd.f32 %v290_v47, %v2128_v10  ;;  %v329_v57 = vadd.f32 %v291_v48, %v2131_v11  ;;  %v222_v62 = vadd.f32 %v190_v55, %v158_v54  ;;  %v2251_v39 = vmul.f32 0.13600498, %v2091_v1 }
  0x11   :  { %3275 = vst [vmem:[#allocation4_spill] sm:$0xff] %v2240_v60  ;;  %3276 = vst [vmem:[#allocation5_spill] sm:$0xff] %v2243_v61  ;;  %v223_v33 = vadd.f32 %v191_v59, %v159_v58  ;;  %v2257_v43 = vmul.f32 0.13600498, %v2160_v20 }
  0x12   :  { %v376_v16 = vrot.slane %v328_v56, 3  ;;  %v408_v17 = vrot.slane %v328_v56, 1  ;;  %v440_v18 = vrot.slane %v328_v56, 7  ;;  %v489_v19 = vrot.slane %v328_v56, 5 }
  0x13   :  { %v490_v22 = vrot.slane %v329_v57, 5  ;;  %v585_v23 = vrot.slane %v329_v57, 3  ;;  %v617_v25 = vrot.slane %v329_v57, 1  ;;  %v649_v26 = vrot.slane %v329_v57, 7 }
  0x14   :  { %v682_v32 = vsel %vm681_vm0, %v376_v16, %v408_v17  ;;  %v256_v36 = vadd.f32 %v222_v62, %v2224_v50 }
  0x15   :  { %v491_v40 = vsel %vm488_vm1, %v489_v19, %v490_v22  ;;  %v699_v0 = vsel %vm698_vm2, %v682_v32, %v440_v18  ;;  %v731_v41 = vsel %vm488_vm1, %v490_v22, %v585_v23 }
  0x16   :  { %v715_v44 = vsel %vm488_vm1, %v699_v0, %v489_v19  ;;  %v748_v45 = vsel %vm747_vm3, %v731_v41, %v617_v25  ;;  %v782_v46 = vmul.f32 0.13600498, %v491_v40  ;;  %v814_v47 = vmul.f32 0.14116763, %v491_v40 }
  0x17   :  { %v765_v48 = vsel %vm764_vm4, %v748_v45, %v649_v26  ;;  %v781_v54 = vmul.f32 0.13600498, %v715_v44  ;;  %v813_v1 = vmul.f32 0.14116763, %v715_v44  ;;  %v1054_v55 = vmul.f32 0.14759426, %v715_v44 }
  0x18   :  { %v815_v56 = vmul.f32 0.14116763, %v765_v48  ;;  %v911_v57 = vrot.slane %v814_v47, 1  ;;  %v1055_v58 = vmul.f32 0.14759426, %v491_v40  ;;  %v1680_v59 = vrot.slane %v814_v47, 5 }
  0x19   :  { %v910_v62 = vrot.slane %v813_v1, 1  ;;  %v1151_v16 = vrot.slane %v1054_v55, 2  ;;  %v1295_v17 = vmul.f32 0.1504663, %v715_v44  ;;  %v1296_v18 = vmul.f32 0.1504663, %v491_v40 }
  0x1a   :  { %v913_v22 = vrot.slane %v815_v56, 1  ;;  %v1152_v23 = vrot.slane %v1055_v58, 2  ;;  %v1535_v19 = vrot.slane %v1054_v55, 4  ;;  %v1536_v32 = vrot.slane %v1055_v58, 4 }
  0x1b   :  { %v912_v25 = vsel %vm909_vm5, %v910_v62, %v911_v57  ;;  %v1391_v0 = vrot.slane %v1295_v17, 3  ;;  %v1392_v41 = vrot.slane %v1296_v18, 3  ;;  %v1679_v26 = vrot.slane %v813_v1, 5 }
  0x1c   :  { %v914_v45 = vsel %vm909_vm5, %v911_v57, %v913_v22  ;;  %v1022_v61 = vadd.f32 %v912_v25, %v781_v54  ;;  %v1153_v60 = vsel %vm1150_vm6, %v1151_v16, %v1152_v23  ;;  %v1537_v47 = vsel %vm747_vm3, %v1535_v19, %v1536_v32 }
  0x1d   :  { %v1023_v53 = vadd.f32 %v914_v45, %v782_v46  ;;  %v1393_v44 = vsel %vm764_vm4, %v1391_v0, %v1392_v41  ;;  %v1681_v40 = vsel %vm488_vm1, %v1679_v26, %v1680_v59  ;;  %v1887_v51 = vrot.slane %v781_v54, 6 }
  0x1e   :  { %v1263_v55 = vadd.f32 %v1153_v60, %v1022_v61  ;;  %v1888_v58 = vrot.slane %v782_v46, 6  ;;  %v1056_v62 = vmul.f32 0.14759426, %v765_v48  ;;  %v1297_v17 = vmul.f32 0.1504663, %v765_v48 }
  0x1f   :  { %v1682_v18 = vrot.slane %v815_v56, 5  ;;  %v1823_v1 = vmul.f32 0.13600498, %v765_v48  ;;  %v257_v57 = vadd.f32 %v223_v33, %v2230_v52  ;;  %v292_v22 = vadd.f32 %v256_v36, %v2184_v30 }
  0x20   :  { %v1503_v16 = vadd.f32 %v1393_v44, %v1263_v55  ;;  %v1889_v19 = vsel %vm698_vm2, %v1887_v51, %v1888_v58  ;;  %v1154_v25 = vrot.slane %v1056_v62, 2  ;;  %v1394_v45 = vrot.slane %v1297_v17, 3 }
  0x21   :  { %v1538_v0 = vrot.slane %v1056_v62, 4  ;;  %v1683_v26 = vsel %vm488_vm1, %v1680_v59, %v1682_v18  ;;  %v1890_v54 = vrot.slane %v1823_v1, 6  ;;  %v293_v60 = vadd.f32 %v257_v57, %v2187_v31 }
  0x22   :  { %v1647_v61 = vadd.f32 %v1537_v47, %v1503_v16  ;;  %v1155_v46 = vsel %vm1150_vm6, %v1152_v23, %v1154_v25  ;;  %v1395_v48 = vsel %vm764_vm4, %v1392_v41, %v1394_v45  ;;  %v330_v33 = vadd.f32 %v292_v22, %v2170_v24 }
  0x23   :  { %v1264_v56 = vadd.f32 %v1155_v46, %v1023_v53  ;;  %v1539_v30 = vsel %vm747_vm3, %v1536_v32, %v1538_v0  ;;  %v1891_v51 = vsel %vm698_vm2, %v1888_v58, %v1890_v54  ;;  %v331_v36 = vadd.f32 %v293_v60, %v2175_v27 }
  0x24   :  { %v1791_v44 = vadd.f32 %v1681_v40, %v1647_v61  ;;  %v377_v55 = vrot.slane %v330_v33, 3  ;;  %v409_v59 = vrot.slane %v330_v33, 1  ;;  %v441_v62 = vrot.slane %v330_v33, 7 }
  0x25   :  { %v1504_v17 = vadd.f32 %v1395_v48, %v1264_v56  ;;  %v492_v31 = vrot.slane %v330_v33, 5  ;;  %v493_v47 = vrot.slane %v331_v36, 5  ;;  %v586_v18 = vrot.slane %v331_v36, 3 }
  0x26   :  { %v1999_v23 = vadd.f32 %v1889_v19, %v1791_v44  ;;  %v618_v1 = vrot.slane %v331_v36, 1  ;;  %v650_v41 = vrot.slane %v331_v36, 7  ;;  %v683_v24 = vsel %vm681_vm0, %v377_v55, %v409_v59 }
  0x27   :  { %v1648_v53 = vadd.f32 %v1539_v30, %v1504_v17  ;;  %v494_v32 = vsel %vm488_vm1, %v492_v31, %v493_v47  ;;  %v700_v58 = vsel %vm698_vm2, %v683_v24, %v441_v62  ;;  %v732_v27 = vsel %vm488_vm1, %v493_v47, %v586_v18 }
  0x28   :  { %2032 = vst.msk [vmem:[%s3267_s1] sm:$0xff] %vm2031_vm7, %v1999_v23  ;;  %v716_v40 = vsel %vm488_vm1, %v700_v58, %v492_v31  ;;  %v749_v57 = vsel %vm747_vm3, %v732_v27, %v618_v1  ;;  %v2289_v22 = vmul.f32 0.13600498, %v494_v32  ;;  %v817_v16 = vmul.f32 0.14116763, %v494_v32 }
  0x29   :  { %v1792_v19 = vadd.f32 %v1683_v26, %v1648_v53  ;;  %v766_v25 = vsel %vm764_vm4, %v749_v57, %v650_v41  ;;  %v783_v45 = vmul.f32 0.13600498, %v716_v40  ;;  %v816_v0 = vmul.f32 0.14116763, %v716_v40 }
  0x2a   :  { %v818_v54 = vmul.f32 0.14116763, %v766_v25  ;;  %v916_v60 = vrot.slane %v817_v16, 1  ;;  %v1057_v61 = vmul.f32 0.14759426, %v716_v40  ;;  %v1685_v46 = vrot.slane %v817_v16, 5 }
  0x2b   :  { %v2000_v48 = vadd.f32 %v1891_v51, %v1792_v19  ;;  %v915_v33 = vrot.slane %v816_v0, 1  ;;  %v1058_v56 = vmul.f32 0.14759426, %v494_v32  ;;  %v1298_v30 = vmul.f32 0.1504663, %v716_v40 }
  0x2c   :  { %v918_v36 = vrot.slane %v818_v54, 1  ;;  %v1156_v44 = vrot.slane %v1057_v61, 2  ;;  %v1299_v55 = vmul.f32 0.1504663, %v494_v32  ;;  %v1540_v59 = vrot.slane %v1057_v61, 4 }
  0x2d   :  { %2033 = vst.msk [vmem:[%s3267_s1 + $0x8] sm:$0xff] %vm2031_vm7, %v2000_v48  ;;  %v917_v26 = vsel %vm909_vm5, %v915_v33, %v916_v60  ;;  %v1157_v62 = vrot.slane %v1058_v56, 2  ;;  %v1396_v17 = vrot.slane %v1298_v30, 3  ;;  %v1541_v31 = vrot.slane %v1058_v56, 4 }
  0x2e   :  { %v919_v47 = vsel %vm909_vm5, %v916_v60, %v918_v36  ;;  %v1024_v51 = vadd.f32 %v917_v26, %v783_v45  ;;  %v1397_v18 = vrot.slane %v1299_v55, 3  ;;  %v1684_v23 = vrot.slane %v816_v0, 5 }
  0x2f   :  { %v1025_v1 = vadd.f32 %v919_v47, %v2289_v22  ;;  %v1158_v41 = vsel %vm1150_vm6, %v1156_v44, %v1157_v62  ;;  %v1892_v24 = vrot.slane %v783_v45, 6  ;;  %v2301_v53 = vmul.f32 0.13600498, %v2165_v21 }
  0x30   :  { %v1265_v32 = vadd.f32 %v1158_v41, %v1024_v51  ;;  %v1398_v58 = vsel %vm764_vm4, %v1396_v17, %v1397_v18  ;;  %v1542_v27 = vsel %vm747_vm3, %v1540_v59, %v1541_v31  ;;  %v1893_v40 = vrot.slane %v2289_v22, 6 }
  0x31   :  { %v1686_v57 = vsel %vm488_vm1, %v1684_v23, %v1685_v46  ;;  %v1059_v16 = vmul.f32 0.14759426, %v766_v25  ;;  %v1300_v19 = vmul.f32 0.1504663, %v766_v25  ;;  %v1687_v0 = vrot.slane %v818_v54, 5 }
  0x32   :  { %v1505_v60 = vadd.f32 %v1398_v58, %v1265_v32  ;;  %v1894_v61 = vsel %vm698_vm2, %v1892_v24, %v1893_v40  ;;  %v1824_v48 = vmul.f32 0.13600498, %v766_v25  ;;  %v2310_v45 = vadd.f32 %v2122_v8, %v2246_v63 }
  0x33   :  { %v1159_v33 = vrot.slane %v1059_v16, 2  ;;  %v1399_v56 = vrot.slane %v1300_v19, 3  ;;  %v1543_v30 = vrot.slane %v1059_v16, 4  ;;  %v70_v36 = vmul.f32 0.14116763, %v2109_v5 }
  0x34   :  { %v1649_v44 = vadd.f32 %v1542_v27, %v1505_v60  ;;  %v1688_v22 = vsel %vm488_vm1, %v1685_v46, %v1687_v0  ;;  %v71_v55 = vmul.f32 0.14116763, %v2139_v13  ;;  %v74_v54 = vmul.f32 0.14116763, %v2144_v14 }
  0x35   :  { %v1160_v59 = vsel %vm1150_vm6, %v1157_v62, %v1159_v33  ;;  %v1400_v25 = vsel %vm764_vm4, %v1397_v18, %v1399_v56  ;;  %v1895_v26 = vrot.slane %v1824_v48, 6  ;;  %v75_v8 = vmul.f32 0.14116763, %v2149_v15 }
  0x36   :  { %v1793_v17 = vadd.f32 %v1686_v57, %v1649_v44  ;;  %v1266_v47 = vadd.f32 %v1160_v59, %v1025_v1  ;;  %v1544_v51 = vsel %vm747_vm3, %v1541_v31, %v1543_v30  ;;  %v2321_v23 = vmul.f32 0.14116763, %v2208_v42  ;;  %v2334_v1 = vld [vmem:[%s3266_s0 + $0x70] sm:$0xff]  ;;  %v2339_v31 = vld [vmem:[%s3266_s0 + $0x78] sm:$0xff] }
  0x37   :  { %v2324_v46 = vmul.f32 0.14116763, %v2221_v49  ;;  %v98_v41 = vadd.f32 %v70_v36, %v2246_v63  ;;  %v99_v24 = vadd.f32 %v71_v55, %v2251_v39  ;;  %v2329_v62 = vadd.f32 %v74_v54, %v2128_v10 }
  0x38   :  { %v2001_v18 = vadd.f32 %v1894_v61, %v1793_v17  ;;  %v1506_v32 = vadd.f32 %v1400_v25, %v1266_v47  ;;  %v2342_v58 = vadd.f32 %v75_v8, %v2131_v11  ;;  %v110_v63 = vadd.f32 %v2321_v23, %v2257_v43 }
  0x39   :  { %v111_v10 = vadd.f32 %v2324_v46, %v2301_v53  ;;  %v2349_v27 = vmul.f32 0.14759426, %v2114_v6  ;;  %v2352_v57 = vmul.f32 0.14759426, %v2119_v7  ;;  %v2355_v16 = vmul.f32 0.14759426, %v2334_v1 }
  0x3a   :  { %2034 = vst.msk [vmem:[%s3267_s1 + $0x10] sm:$0xff] %vm2031_vm7, %v2001_v18  ;;  %v1650_v11 = vadd.f32 %v1544_v51, %v1506_v32  ;;  %v2362_v19 = vmul.f32 0.14759426, %v2339_v31  ;;  %v160_v0 = vadd.f32 %v2104_v4, %v98_v41  ;;  %v161_v60 = vadd.f32 %v2134_v12, %v99_v24 }
  0x3b   :  { %v1896_v61 = vsel %vm698_vm2, %v1893_v40, %v1895_v26  ;;  %v192_v48 = vmul.f32 0.1504663, %v2096_v2  ;;  %v193_v33 = vmul.f32 0.1504663, %v2101_v3  ;;  %v46_v56 = vmul.f32 0.13600498, %v2109_v5 }
  0x3c   :  { %v1794_v30 = vadd.f32 %v1688_v22, %v1650_v11  ;;  %v2371_v36 = vadd.f32 %v2355_v16, %v110_v63  ;;  %v47_v44 = vmul.f32 0.13600498, %v2139_v13  ;;  %v2375_v55 = vmul.f32 0.13600498, %v2208_v42  ;;  %v2401_v26 = vld [vmem:[%s3266_s0 + $0x88] sm:$0xff] }
  0x3d   :  { %v224_v4 = vadd.f32 %v192_v48, %v160_v0  ;;  %v225_v59 = vadd.f32 %v193_v33, %v161_v60  ;;  %v2378_v12 = vmul.f32 0.13600498, %v2221_v49  ;;  %v2381_v2 = vmul.f32 0.14116763, %v2334_v1  ;;  %v2396_v49 = vld [vmem:[%s3266_s0 + $0x80] sm:$0xff] }
  0x3e   :  { %3277 = vst [vmem:[#allocation6_spill] sm:$0xff] %v2371_v36  ;;  %v2002_v3 = vadd.f32 %v1896_v61, %v1794_v30  ;;  %v2384_v5 = vmul.f32 0.14116763, %v2339_v31  ;;  %v100_v40 = vadd.f32 %v2178_v28, %v46_v56  ;;  %v101_v22 = vadd.f32 %v2181_v29, %v47_v44 }
  0x3f   :  { %v2389_v13 = vadd.f32 %v2362_v19, %v111_v10  ;;  %v258_v42 = vadd.f32 %v224_v4, %v2349_v27  ;;  %v259_v25 = vadd.f32 %v225_v59, %v2352_v57  ;;  %v112_v28 = vadd.f32 %v2381_v2, %v2375_v55 }
  0x40   :  { %2035 = vst.msk [vmem:[%s3267_s1 + $0x18] sm:$0xff] %vm2031_vm7, %v2002_v3  ;;  %v113_v29 = vadd.f32 %v2384_v5, %v2378_v12  ;;  %v2412_v17 = vmul.f32 0.14759426, %v2144_v14  ;;  %v2415_v47 = vmul.f32 0.14759426, %v2396_v49  ;;  %v162_v18 = vadd.f32 %v2224_v50, %v100_v40 }
  0x41   :  { %3278 = vst [vmem:[#allocation7_spill] sm:$0xff] %v2389_v13  ;;  %v2418_v51 = vmul.f32 0.14759426, %v2401_v26  ;;  %v294_v41 = vadd.f32 %v258_v42, %v74_v54  ;;  %v295_v24 = vadd.f32 %v259_v25, %v75_v8  ;;  %v163_v32 = vadd.f32 %v2230_v52, %v101_v22 }
  0x42   :  { %3279 = vst [vmem:[#allocation8_spill] sm:$0xff] %v2415_v47  ;;  %v2423_v63 = vmul.f32 0.14759426, %v2149_v15  ;;  %v2426_v10 = vadd.f32 %v2415_v47, %v112_v28  ;;  %v194_v11 = vmul.f32 0.1504663, %v2114_v6 }
  0x43   :  { %3280 = vst [vmem:[#allocation9_spill] sm:$0xff] %v2418_v51  ;;  %v195_v0 = vmul.f32 0.1504663, %v2119_v7  ;;  %v332_v60 = vadd.f32 %v294_v41, %v2257_v43  ;;  %v333_v61 = vadd.f32 %v295_v24, %v2301_v53  ;;  %v2433_v54 = vadd.f32 %v2418_v51, %v113_v29 }
  0x44   :  { %3281 = vst [vmem:[#allocation10_spill] sm:$0xff] %v2426_v10  ;;  %v2436_v50 = vmul.f32 0.13600498, %v2334_v1  ;;  %v226_v52 = vadd.f32 %v194_v11, %v162_v18  ;;  %v2439_v48 = vmul.f32 0.13600498, %v2339_v31  ;;  %v2455_v29 = vadd.f32 %v2125_v9, %v2251_v39 }
  0x45   :  { %3282 = vst [vmem:[#allocation11_spill] sm:$0xff] %v2433_v54  ;;  %v227_v8 = vadd.f32 %v195_v0, %v163_v32  ;;  %v2442_v33 = vmul.f32 0.14116763, %v2396_v49  ;;  %v378_v6 = vrot.slane %v332_v60, 3  ;;  %v410_v7 = vrot.slane %v332_v60, 1 }
  0x46   :  { %v442_v56 = vrot.slane %v332_v60, 7  ;;  %v495_v43 = vrot.slane %v332_v60, 5  ;;  %v496_v30 = vrot.slane %v333_v61, 5  ;;  %v587_v53 = vrot.slane %v333_v61, 3 }
  0x47   :  { %v619_v44 = vrot.slane %v333_v61, 1  ;;  %v651_v4 = vrot.slane %v333_v61, 7  ;;  %v684_v59 = vsel %vm681_vm0, %v378_v6, %v410_v7  ;;  %v260_v3 = vadd.f32 %v226_v52, %v2412_v17 }
  0x48   :  { %v261_v40 = vadd.f32 %v227_v8, %v2423_v63  ;;  %v2448_v22 = vmul.f32 0.14116763, %v2401_v26  ;;  %v497_v42 = vsel %vm488_vm1, %v495_v43, %v496_v30  ;;  %v701_v25 = vsel %vm698_vm2, %v684_v59, %v442_v56 }
  0x49   :  { %v733_v28 = vsel %vm488_vm1, %v496_v30, %v587_v53  ;;  %v717_v41 = vsel %vm488_vm1, %v701_v25, %v495_v43  ;;  %v2459_v18 = vmul.f32 0.13600498, %v497_v42  ;;  %v820_v32 = vmul.f32 0.14116763, %v497_v42 }
  0x4a   :  { %v750_v24 = vsel %vm747_vm3, %v733_v28, %v619_v44  ;;  %v785_v0 = vmul.f32 0.13600498, %v717_v41  ;;  %v819_v60 = vmul.f32 0.14116763, %v717_v41  ;;  %v1060_v61 = vmul.f32 0.14759426, %v717_v41 }
  0x4b   :  { %v767_v11 = vsel %vm764_vm4, %v750_v24, %v651_v4  ;;  %v921_v8 = vrot.slane %v820_v32, 1  ;;  %v1061_v6 = vmul.f32 0.14759426, %v497_v42  ;;  %v2464_v7 = vadd.f32 %v2442_v33, %v2436_v50 }
  0x4c   :  { %v821_v52 = vmul.f32 0.14116763, %v767_v11  ;;  %v920_v9 = vrot.slane %v819_v60, 1  ;;  %v1161_v39 = vrot.slane %v1060_v61, 2  ;;  %v1301_v56 = vmul.f32 0.1504663, %v717_v41 }
  0x4d   :  { %v1302_v43 = vmul.f32 0.1504663, %v497_v42  ;;  %v1162_v53 = vrot.slane %v1061_v6, 2  ;;  %v1545_v44 = vrot.slane %v1060_v61, 4  ;;  %v1546_v59 = vrot.slane %v1061_v6, 4 }
  0x4e   :  { %v923_v30 = vrot.slane %v821_v52, 1  ;;  %v922_v4 = vsel %vm909_vm5, %v920_v9, %v921_v8  ;;  %v1401_v25 = vrot.slane %v1301_v56, 3  ;;  %v1690_v24 = vrot.slane %v820_v32, 5 }
  0x4f   :  { %v1402_v28 = vrot.slane %v1302_v43, 3  ;;  %v1026_v10 = vadd.f32 %v922_v4, %v785_v0  ;;  %v1163_v13 = vsel %vm1150_vm6, %v1161_v39, %v1162_v53  ;;  %v1689_v36 = vrot.slane %v819_v60, 5 }
  0x50   :  { %v924_v54 = vsel %vm909_vm5, %v921_v8, %v923_v30  ;;  %v1547_v42 = vsel %vm747_vm3, %v1545_v44, %v1546_v59  ;;  %v1897_v47 = vrot.slane %v785_v0, 6  ;;  %v1898_v6 = vrot.slane %v2459_v18, 6 }
  0x51   :  { %v1027_v51 = vadd.f32 %v924_v54, %v2459_v18  ;;  %v1403_v41 = vsel %vm764_vm4, %v1401_v25, %v1402_v28  ;;  %v1267_v61 = vadd.f32 %v1163_v13, %v1026_v10  ;;  %v1062_v9 = vmul.f32 0.14759426, %v767_v11 }
  0x52   :  { %v1303_v56 = vmul.f32 0.1504663, %v767_v11  ;;  %v1692_v43 = vrot.slane %v821_v52, 5  ;;  %v1825_v32 = vmul.f32 0.13600498, %v767_v11  ;;  %v296_v8 = vadd.f32 %v260_v3, %v2190_v34 }
  0x53   :  { %v297_v30 = vadd.f32 %v261_v40, %v2193_v35  ;;  %v1507_v39 = vadd.f32 %v1403_v41, %v1267_v61  ;;  %v1691_v60 = vsel %vm488_vm1, %v1689_v36, %v1690_v24  ;;  %v1164_v54 = vrot.slane %v1062_v9, 2 }
  0x54   :  { %v1404_v4 = vrot.slane %v1303_v56, 3  ;;  %v1899_v25 = vsel %vm698_vm2, %v1897_v47, %v1898_v6  ;;  %v1548_v44 = vrot.slane %v1062_v9, 4  ;;  %v1900_v0 = vrot.slane %v1825_v32, 6 }
  0x55   :  { %v334_v13 = vadd.f32 %v296_v8, %v2375_v55  ;;  %v1651_v10 = vadd.f32 %v1547_v42, %v1507_v39  ;;  %v1165_v18 = vsel %vm1150_vm6, %v1162_v53, %v1164_v54  ;;  %v335_v34 = vadd.f32 %v297_v30, %v2378_v12 }
  0x56   :  { %v1405_v11 = vsel %vm764_vm4, %v1402_v28, %v1404_v4  ;;  %v1268_v3 = vadd.f32 %v1165_v18, %v1027_v51  ;;  %v1549_v35 = vsel %vm747_vm3, %v1546_v59, %v1548_v44  ;;  %v1693_v36 = vsel %vm488_vm1, %v1690_v24, %v1692_v43 }
  0x57   :  { %v379_v40 = vrot.slane %v334_v13, 3  ;;  %v1795_v52 = vadd.f32 %v1691_v60, %v1651_v10  ;;  %v411_v41 = vrot.slane %v334_v13, 1  ;;  %v443_v47 = vrot.slane %v334_v13, 7 }
  0x58   :  { %v498_v61 = vrot.slane %v334_v13, 5  ;;  %v1508_v9 = vadd.f32 %v1405_v11, %v1268_v3  ;;  %v499_v56 = vrot.slane %v335_v34, 5  ;;  %v588_v55 = vrot.slane %v335_v34, 3 }
  0x59   :  { %v620_v42 = vrot.slane %v335_v34, 1  ;;  %v2003_v32 = vadd.f32 %v1899_v25, %v1795_v52  ;;  %v1901_v53 = vsel %vm698_vm2, %v1898_v6, %v1900_v0  ;;  %v652_v28 = vrot.slane %v335_v34, 7 }
  0x5a   :  { %v685_v12 = vsel %vm681_vm0, %v379_v40, %v411_v41  ;;  %v1652_v51 = vadd.f32 %v1549_v35, %v1508_v9  ;;  %v500_v59 = vsel %vm488_vm1, %v498_v61, %v499_v56  ;;  %v734_v43 = vsel %vm488_vm1, %v499_v56, %v588_v55 }
  0x5b   :  { %v702_v24 = vsel %vm698_vm2, %v685_v12, %v443_v47  ;;  %2036 = vst.msk [vmem:[%s3267_s1 + $0x20] sm:$0xff] %vm2031_vm7, %v2003_v32  ;;  %v751_v30 = vsel %vm747_vm3, %v734_v43, %v620_v42  ;;  %v788_v6 = vmul.f32 0.13600498, %v500_v59  ;;  %v823_v39 = vmul.f32 0.14116763, %v500_v59 }
  0x5c   :  { %v718_v8 = vsel %vm488_vm1, %v702_v24, %v498_v61  ;;  %v1796_v60 = vadd.f32 %v1693_v36, %v1652_v51  ;;  %v768_v54 = vsel %vm764_vm4, %v751_v30, %v652_v28  ;;  %v1064_v34 = vmul.f32 0.14759426, %v500_v59 }
  0x5d   :  { %v787_v4 = vmul.f32 0.13600498, %v718_v8  ;;  %v822_v25 = vmul.f32 0.14116763, %v718_v8  ;;  %v824_v44 = vmul.f32 0.14116763, %v768_v54 }
  0x5e   :  { %v926_v0 = vrot.slane %v823_v39, 1  ;;  %v1063_v13 = vmul.f32 0.14759426, %v718_v8  ;;  %v1695_v10 = vrot.slane %v823_v39, 5  ;;  %v2004_v18 = vadd.f32 %v1901_v53, %v1796_v60 }
  0x5f   :  { %v925_v11 = vrot.slane %v822_v25, 1  ;;  %v1304_v3 = vmul.f32 0.1504663, %v718_v8  ;;  %v928_v35 = vrot.slane %v824_v44, 1  ;;  %v1305_v52 = vmul.f32 0.1504663, %v500_v59 }
  0x60   :  { %v1166_v40 = vrot.slane %v1063_v13, 2  ;;  %v1550_v41 = vrot.slane %v1063_v13, 4  ;;  %2037 = vst.msk [vmem:[%s3267_s1 + $0x28] sm:$0xff] %vm2031_vm7, %v2004_v18  ;;  %v1167_v47 = vrot.slane %v1064_v34, 2  ;;  %v1551_v9 = vrot.slane %v1064_v34, 4 }
  0x61   :  { %v927_v36 = vsel %vm909_vm5, %v925_v11, %v926_v0  ;;  %v1406_v61 = vrot.slane %v1304_v3, 3  ;;  %v929_v56 = vsel %vm909_vm5, %v926_v0, %v928_v35  ;;  %v1407_v42 = vrot.slane %v1305_v52, 3  ;;  %v2519_v52 = vld [vmem:[%s3266_s0 + $0x98] sm:$0xff] }
  0x62   :  { %v1028_v55 = vadd.f32 %v927_v36, %v787_v4  ;;  %v1694_v32 = vrot.slane %v822_v25, 5  ;;  %v1029_v53 = vadd.f32 %v929_v56, %v788_v6  ;;  %v1168_v28 = vsel %vm1150_vm6, %v1166_v40, %v1167_v47 }
  0x63   :  { %v1552_v12 = vsel %vm747_vm3, %v1550_v41, %v1551_v9  ;;  %v1902_v51 = vrot.slane %v787_v4, 6  ;;  %v1408_v24 = vsel %vm764_vm4, %v1406_v61, %v1407_v42  ;;  %v1903_v8 = vrot.slane %v788_v6, 6  ;;  %v2514_v6 = vld [vmem:[%s3266_s0 + $0x90] sm:$0xff] }
  0x64   :  { %v1269_v59 = vadd.f32 %v1168_v28, %v1028_v55  ;;  %v1696_v43 = vsel %vm488_vm1, %v1694_v32, %v1695_v10  ;;  %v1065_v30 = vmul.f32 0.14759426, %v768_v54  ;;  %v1306_v39 = vmul.f32 0.1504663, %v768_v54 }
  0x65   :  { %v1697_v60 = vrot.slane %v824_v44, 5  ;;  %v115_v0 = vadd.f32 %v2448_v22, %v2439_v48  ;;  %v1904_v25 = vsel %vm698_vm2, %v1902_v51, %v1903_v8  ;;  %v1826_v18 = vmul.f32 0.13600498, %v768_v54 }
  0x66   :  { %v1509_v13 = vadd.f32 %v1408_v24, %v1269_v59  ;;  %v164_v11 = vadd.f32 %v2349_v27, %v2310_v45  ;;  %v1169_v4 = vrot.slane %v1065_v30, 2  ;;  %v1409_v34 = vrot.slane %v1306_v39, 3  ;;  %v2554_v24 = vld [vmem:[%s3266_s0 + $0xa0] sm:$0xff] }
  0x67   :  { %v1553_v3 = vrot.slane %v1065_v30, 4  ;;  %v1698_v35 = vsel %vm488_vm1, %v1695_v10, %v1697_v60  ;;  %v1905_v40 = vrot.slane %v1826_v18, 6  ;;  %v2522_v54 = vmul.f32 0.14759426, %v2160_v20 }
  0x68   :  { %v1653_v44 = vadd.f32 %v1552_v12, %v1509_v13  ;;  %v2525_v45 = vmul.f32 0.14759426, %v2514_v6  ;;  %v1170_v27 = vsel %vm1150_vm6, %v1167_v47, %v1169_v4  ;;  %v1410_v10 = vsel %vm764_vm4, %v1407_v42, %v1409_v34 }
  0x69   :  { %v1554_v41 = vsel %vm747_vm3, %v1551_v9, %v1553_v3  ;;  %v2531_v36 = vmul.f32 0.14759426, %v2519_v52  ;;  %v1270_v56 = vadd.f32 %v1170_v27, %v1029_v53  ;;  %v1906_v55 = vsel %vm698_vm2, %v1903_v8, %v1905_v40  ;;  %v3286_v27 = vld [vmem:[#allocation3_spill] sm:$0xff] }
  0x6a   :  { %v1797_v61 = vadd.f32 %v1696_v43, %v1653_v44  ;;  %v165_v32 = vadd.f32 %v2352_v57, %v2455_v29  ;;  %v2537_v28 = vmul.f32 0.14759426, %v2165_v21  ;;  %v2541_v47 = vadd.f32 %v2525_v45, %v2464_v7 }
  0x6b   :  { %v196_v42 = vmul.f32 0.1504663, %v2144_v14  ;;  %v197_v9 = vmul.f32 0.1504663, %v2149_v15  ;;  %v1510_v51 = vadd.f32 %v1410_v10, %v1270_v56  ;;  %v2546_v53 = vmul.f32 0.13600498, %v2396_v49 }
  0x6c   :  { %v2005_v12 = vadd.f32 %v1904_v25, %v1797_v61  ;;  %v2549_v59 = vmul.f32 0.13600498, %v2401_v26  ;;  %v2557_v7 = vmul.f32 0.14116763, %v2514_v6  ;;  %v2560_v14 = vmul.f32 0.14116763, %v2519_v52 }
  0x6d   :  { %v228_v57 = vadd.f32 %v196_v42, %v164_v11  ;;  %v229_v29 = vadd.f32 %v197_v9, %v165_v32  ;;  %v1654_v15 = vadd.f32 %v1554_v41, %v1510_v51  ;;  %v2567_v49 = vadd.f32 %v2531_v36, %v115_v0  ;;  %v2585_v0 = vld [vmem:[%s3266_s0 + $0xa8] sm:$0xff] }
  0x6e   :  { %2038 = vst.msk [vmem:[%s3267_s1 + $0x30] sm:$0xff] %vm2031_vm7, %v2005_v12  ;;  %v2570_v26 = vmul.f32 0.14759426, %v2554_v24  ;;  %v166_v43 = vadd.f32 %v2412_v17, %v2197_v37  ;;  %v116_v39 = vadd.f32 %v2557_v7, %v2546_v53  ;;  %v2580_v60 = vadd.f32 %v2560_v14, %v2549_v59 }
  0x6f   :  { %3283 = vst [vmem:[#allocation12_spill] sm:$0xff] %v2567_v49  ;;  %v262_v8 = vadd.f32 %v228_v57, %v2522_v54  ;;  %v263_v30 = vadd.f32 %v229_v29, %v2537_v28  ;;  %v1798_v13 = vadd.f32 %v1698_v35, %v1654_v15  ;;  %v167_v37 = vadd.f32 %v2423_v63, %v2200_v38  ;;  %v2607_v38 = vld [vmem:[%s3266_s0 + $0xb0] sm:$0xff]  ;;  %v3285_v63 = vld [vmem:[#allocation2_spill] sm:$0xff] }
  0x70   :  { %v198_v17 = vmul.f32 0.1504663, %v2160_v20  ;;  %v199_v25 = vmul.f32 0.1504663, %v2165_v21  ;;  %v2594_v4 = vmul.f32 0.14759426, %v2585_v0  ;;  %v2597_v34 = vadd.f32 %v2570_v26, %v116_v39 }
  0x71   :  { %v298_v18 = vadd.f32 %v262_v8, %v2321_v23  ;;  %v299_v11 = vadd.f32 %v263_v30, %v2324_v46  ;;  %v2006_v3 = vadd.f32 %v1906_v55, %v1798_v13  ;;  %v2600_v40 = vmul.f32 0.13600498, %v2514_v6 }
  0x72   :  { %3284 = vst [vmem:[#allocation13_spill] sm:$0xff] %v2597_v34  ;;  %v230_v35 = vadd.f32 %v198_v17, %v166_v43  ;;  %v231_v44 = vadd.f32 %v199_v25, %v167_v37  ;;  %v2610_v23 = vmul.f32 0.13600498, %v2519_v52  ;;  %v2613_v46 = vmul.f32 0.14116763, %v2554_v24 }
  0x73   :  { %v336_v20 = vadd.f32 %v298_v18, %v2436_v50  ;;  %v337_v21 = vadd.f32 %v299_v11, %v2439_v48  ;;  %2039 = vst.msk [vmem:[%s3267_s1 + $0x38] sm:$0xff] %vm2031_vm7, %v2006_v3  ;;  %v2622_v10 = vmul.f32 0.14116763, %v2585_v0  ;;  %v2625_v41 = vmul.f32 0.14759426, %v2607_v38 }
  0x74   :  { %v264_v50 = vadd.f32 %v230_v35, %v3285_v63  ;;  %v265_v48 = vadd.f32 %v231_v44, %v3286_v27  ;;  %v2632_v43 = vadd.f32 %v2613_v46, %v2600_v40 }
  0x75   :  { %v380_v61 = vrot.slane %v336_v20, 3  ;;  %v412_v56 = vrot.slane %v336_v20, 1  ;;  %v444_v55 = vrot.slane %v336_v20, 7  ;;  %v501_v32 = vrot.slane %v336_v20, 5 }
  0x76   :  { %v502_v42 = vrot.slane %v337_v21, 5  ;;  %v589_v9 = vrot.slane %v337_v21, 3  ;;  %v621_v12 = vrot.slane %v337_v21, 1  ;;  %v653_v51 = vrot.slane %v337_v21, 7 }
  0x77   :  { %v686_v57 = vsel %vm681_vm0, %v380_v61, %v412_v56  ;;  %v300_v29 = vadd.f32 %v264_v50, %v2381_v2  ;;  %v301_v15 = vadd.f32 %v265_v48, %v2384_v5  ;;  %v2639_v13 = vadd.f32 %v2622_v10, %v2610_v23 }
  0x78   :  { %v503_v8 = vsel %vm488_vm1, %v501_v32, %v502_v42  ;;  %v703_v30 = vsel %vm698_vm2, %v686_v57, %v444_v55  ;;  %v735_v39 = vsel %vm488_vm1, %v502_v42, %v589_v9 }
  0x79   :  { %v719_v37 = vsel %vm488_vm1, %v703_v30, %v501_v32  ;;  %v752_v2 = vsel %vm747_vm3, %v735_v39, %v621_v12  ;;  %v790_v17 = vmul.f32 0.13600498, %v503_v8  ;;  %v826_v5 = vmul.f32 0.14116763, %v503_v8 }
  0x7a   :  { %v769_v25 = vsel %vm764_vm4, %v752_v2, %v653_v51  ;;  %v789_v18 = vmul.f32 0.13600498, %v719_v37  ;;  %v825_v11 = vmul.f32 0.14116763, %v719_v37  ;;  %v1066_v3 = vmul.f32 0.14759426, %v719_v37 }
  0x7b   :  { %v827_v35 = vmul.f32 0.14116763, %v769_v25  ;;  %v931_v44 = vrot.slane %v826_v5, 1  ;;  %v1067_v20 = vmul.f32 0.14759426, %v503_v8  ;;  %v1700_v21 = vrot.slane %v826_v5, 5 }
  0x7c   :  { %v930_v63 = vrot.slane %v825_v11, 1  ;;  %v1171_v50 = vrot.slane %v1066_v3, 2  ;;  %v1307_v27 = vmul.f32 0.1504663, %v719_v37  ;;  %v1308_v48 = vmul.f32 0.1504663, %v503_v8 }
  0x7d   :  { %v933_v61 = vrot.slane %v827_v35, 1  ;;  %v1172_v56 = vrot.slane %v1067_v20, 2  ;;  %v1555_v55 = vrot.slane %v1066_v3, 4  ;;  %v1556_v32 = vrot.slane %v1067_v20, 4 }
  0x7e   :  { %v932_v42 = vsel %vm909_vm5, %v930_v63, %v931_v44  ;;  %v1411_v9 = vrot.slane %v1307_v27, 3  ;;  %v1412_v12 = vrot.slane %v1308_v48, 3  ;;  %v1699_v51 = vrot.slane %v825_v11, 5 }
  0x7f   :  { %v934_v57 = vsel %vm909_vm5, %v931_v44, %v933_v61  ;;  %v1030_v30 = vadd.f32 %v932_v42, %v789_v18  ;;  %v1173_v39 = vsel %vm1150_vm6, %v1171_v50, %v1172_v56  ;;  %v1557_v2 = vsel %vm747_vm3, %v1555_v55, %v1556_v32 }
  0x80   :  { %v1031_v5 = vadd.f32 %v934_v57, %v790_v17  ;;  %v1413_v37 = vsel %vm764_vm4, %v1411_v9, %v1412_v12  ;;  %v1701_v8 = vsel %vm488_vm1, %v1699_v51, %v1700_v21  ;;  %v1907_v34 = vrot.slane %v789_v18, 6 }
  0x81   :  { %v1271_v3 = vadd.f32 %v1173_v39, %v1030_v30  ;;  %v1908_v20 = vrot.slane %v790_v17, 6  ;;  %v1068_v49 = vmul.f32 0.14759426, %v769_v25  ;;  %v1309_v63 = vmul.f32 0.1504663, %v769_v25 }
  0x82   :  { %v1702_v27 = vrot.slane %v827_v35, 5  ;;  %v1827_v48 = vmul.f32 0.13600498, %v769_v25  ;;  %v338_v11 = vadd.f32 %v300_v29, %v2546_v53  ;;  %v339_v44 = vadd.f32 %v301_v15, %v2549_v59 }
  0x83   :  { %v1511_v61 = vadd.f32 %v1413_v37, %v1271_v3  ;;  %v1909_v50 = vsel %vm698_vm2, %v1907_v34, %v1908_v20  ;;  %v1174_v55 = vrot.slane %v1068_v49, 2  ;;  %v1414_v42 = vrot.slane %v1309_v63, 3 }
  0x84   :  { %v1558_v57 = vrot.slane %v1068_v49, 4  ;;  %v1703_v9 = vsel %vm488_vm1, %v1700_v21, %v1702_v27  ;;  %v1910_v51 = vrot.slane %v1827_v48, 6  ;;  %v381_v18 = vrot.slane %v338_v11, 3 }
  0x85   :  { %v1655_v30 = vadd.f32 %v1557_v2, %v1511_v61  ;;  %v1175_v17 = vsel %vm1150_vm6, %v1172_v56, %v1174_v55  ;;  %v1415_v35 = vsel %vm764_vm4, %v1412_v12, %v1414_v42  ;;  %v413_v25 = vrot.slane %v338_v11, 1 }
  0x86   :  { %v1272_v39 = vadd.f32 %v1175_v17, %v1031_v5  ;;  %v1559_v53 = vsel %vm747_vm3, %v1556_v32, %v1558_v57  ;;  %v1911_v59 = vsel %vm698_vm2, %v1908_v20, %v1910_v51  ;;  %v445_v29 = vrot.slane %v338_v11, 7 }
  0x87   :  { %v1799_v34 = vadd.f32 %v1701_v8, %v1655_v30  ;;  %v504_v15 = vrot.slane %v338_v11, 5  ;;  %v505_v37 = vrot.slane %v339_v44, 5  ;;  %v590_v49 = vrot.slane %v339_v44, 3 }
  0x88   :  { %v1512_v3 = vadd.f32 %v1415_v35, %v1272_v39  ;;  %v622_v21 = vrot.slane %v339_v44, 1  ;;  %v654_v63 = vrot.slane %v339_v44, 7  ;;  %v687_v2 = vsel %vm681_vm0, %v381_v18, %v413_v25 }
  0x89   :  { %v2007_v27 = vadd.f32 %v1909_v50, %v1799_v34  ;;  %v506_v56 = vsel %vm488_vm1, %v504_v15, %v505_v37  ;;  %v704_v12 = vsel %vm698_vm2, %v687_v2, %v445_v29  ;;  %v736_v5 = vsel %vm488_vm1, %v505_v37, %v590_v49 }
  0x8a   :  { %v1656_v32 = vadd.f32 %v1559_v53, %v1512_v3  ;;  %v720_v20 = vsel %vm488_vm1, %v704_v12, %v504_v15  ;;  %v753_v8 = vsel %vm747_vm3, %v736_v5, %v622_v21  ;;  %v792_v48 = vmul.f32 0.13600498, %v506_v56 }
  0x8b   :  { %2040 = vst.msk [vmem:[%s3267_s1 + $0x40] sm:$0xff] %vm2031_vm7, %v2007_v27  ;;  %v770_v11 = vsel %vm764_vm4, %v753_v8, %v654_v63  ;;  %v791_v44 = vmul.f32 0.13600498, %v720_v20  ;;  %v828_v61 = vmul.f32 0.14116763, %v720_v20 }
  0x8c   :  { %v829_v50 = vmul.f32 0.14116763, %v506_v56  ;;  %v1800_v55 = vadd.f32 %v1703_v9, %v1656_v32  ;;  %v830_v42 = vmul.f32 0.14116763, %v770_v11  ;;  %v1069_v57 = vmul.f32 0.14759426, %v720_v20 }
  0x8d   :  { %v1070_v51 = vmul.f32 0.14759426, %v506_v56  ;;  %v935_v18 = vrot.slane %v828_v61, 1  ;;  %v1310_v17 = vmul.f32 0.1504663, %v720_v20  ;;  %v1704_v27 = vrot.slane %v828_v61, 5 }
  0x8e   :  { %v936_v30 = vrot.slane %v829_v50, 1  ;;  %v1311_v35 = vmul.f32 0.1504663, %v506_v56  ;;  %v2008_v25 = vadd.f32 %v1911_v59, %v1800_v55  ;;  %v938_v39 = vrot.slane %v830_v42, 1 }
  0x8f   :  { %v1176_v53 = vrot.slane %v1069_v57, 2  ;;  %v1177_v29 = vrot.slane %v1070_v51, 2  ;;  %v1416_v15 = vrot.slane %v1310_v17, 3  ;;  %v1560_v49 = vrot.slane %v1069_v57, 4 }
  0x90   :  { %v937_v34 = vsel %vm909_vm5, %v935_v18, %v936_v30  ;;  %v1417_v37 = vrot.slane %v1311_v35, 3  ;;  %2041 = vst.msk [vmem:[%s3267_s1 + $0x48] sm:$0xff] %vm2031_vm7, %v2008_v25  ;;  %v939_v9 = vsel %vm909_vm5, %v936_v30, %v938_v39  ;;  %v1561_v63 = vrot.slane %v1070_v51, 4  ;;  %v2682_v30 = vld [vmem:[%s3266_s0 + $0xb8] sm:$0xff] }
  0x91   :  { %v1032_v3 = vadd.f32 %v937_v34, %v791_v44  ;;  %v1178_v21 = vsel %vm1150_vm6, %v1176_v53, %v1177_v29  ;;  %v1033_v59 = vadd.f32 %v939_v9, %v792_v48  ;;  %v1705_v56 = vrot.slane %v829_v50, 5 }
  0x92   :  { %v1418_v2 = vsel %vm764_vm4, %v1416_v15, %v1417_v37  ;;  %v1562_v5 = vsel %vm747_vm3, %v1560_v49, %v1561_v63  ;;  %v1912_v32 = vrot.slane %v791_v44, 6  ;;  %v1913_v20 = vrot.slane %v792_v48, 6 }
  0x93   :  { %v1273_v12 = vadd.f32 %v1178_v21, %v1032_v3  ;;  %v1706_v8 = vsel %vm488_vm1, %v1704_v27, %v1705_v56  ;;  %v1071_v55 = vmul.f32 0.14759426, %v770_v11  ;;  %v1312_v57 = vmul.f32 0.1504663, %v770_v11 }
  0x94   :  { %v1707_v18 = vrot.slane %v830_v42, 5  ;;  %v1914_v17 = vsel %vm698_vm2, %v1912_v32, %v1913_v20  ;;  %v1828_v61 = vmul.f32 0.13600498, %v770_v11  ;;  %v2686_v50 = vmul.f32 0.14759426, %v2682_v30 }
  0x95   :  { %v1513_v51 = vadd.f32 %v1418_v2, %v1273_v12  ;;  %v1179_v35 = vrot.slane %v1071_v55, 2  ;;  %v1419_v44 = vrot.slane %v1312_v57, 3  ;;  %v1563_v48 = vrot.slane %v1071_v55, 4 }
  0x96   :  { %v1708_v25 = vsel %vm488_vm1, %v1705_v56, %v1707_v18  ;;  %v2691_v42 = vadd.f32 %v2594_v4, %v2580_v60  ;;  %v1915_v53 = vrot.slane %v1828_v61, 6  ;;  %v168_v34 = vadd.f32 %v2522_v54, %v2329_v62  ;;  %v2068_v54 = vld [vmem:[%s3266_s0 + $0x60] sm:$0xff] }
  0x97   :  { %v1657_v39 = vadd.f32 %v1562_v5, %v1513_v51  ;;  %v1180_v15 = vsel %vm1150_vm6, %v1177_v29, %v1179_v35  ;;  %v1420_v11 = vsel %vm764_vm4, %v1417_v37, %v1419_v44  ;;  %v1564_v49 = vsel %vm747_vm3, %v1561_v63, %v1563_v48  ;;  %v2730_v5 = vld [vmem:[%s3266_s0 + $0xc8] sm:$0xff] }
  0x98   :  { %v169_v9 = vadd.f32 %v2537_v28, %v2342_v58  ;;  %v1274_v21 = vadd.f32 %v1180_v15, %v1033_v59  ;;  %v1916_v2 = vsel %vm698_vm2, %v1913_v20, %v1915_v53  ;;  %v2703_v60 = vadd.f32 %v2625_v41, %v2632_v43  ;;  %v2069_v58 = vld [vmem:[%s3266_s0 + $0x68] sm:$0xff]  ;;  %v2719_v43 = vld [vmem:[%s3266_s0 + $0xc0] sm:$0xff]  ;;  %v3290_v15 = vld [vmem:[#allocation5_spill] sm:$0xff] }
  0x99   :  { %v1801_v3 = vadd.f32 %v1706_v8, %v1657_v39  ;;  %v2707_v62 = vadd.f32 %v2686_v50, %v2639_v13  ;;  %v200_v29 = vmul.f32 0.1504663, %v2068_v54  ;;  %v201_v28 = vmul.f32 0.1504663, %v2069_v58  ;;  %v3288_v39 = vld [vmem:[#allocation4_spill] sm:$0xff] }
  0x9a   :  { %v60_v37 = vmul.f32 0.13600498, %v2554_v24  ;;  %v1514_v59 = vadd.f32 %v1420_v11, %v1274_v21  ;;  %v2722_v13 = vmul.f32 0.13600498, %v2585_v0  ;;  %v2725_v27 = vmul.f32 0.14116763, %v2607_v38 }
  0x9b   :  { %v2009_v63 = vadd.f32 %v1914_v17, %v1801_v3  ;;  %v232_v56 = vadd.f32 %v200_v29, %v168_v34  ;;  %v233_v12 = vadd.f32 %v201_v28, %v169_v9  ;;  %v2733_v32 = vmul.f32 0.14116763, %v2682_v30  ;;  %v3292_v21 = vld [vmem:[#allocation9_spill] sm:$0xff]  ;;  %v2778_v54 = vld [vmem:[%s3266_s0 + $0xd0] sm:$0xff] }
  0x9c   :  { %v2736_v20 = vmul.f32 0.14759426, %v2719_v43  ;;  %v1658_v8 = vadd.f32 %v1564_v49, %v1514_v59  ;;  %v120_v55 = vadd.f32 %v2725_v27, %v60_v37  ;;  %v2744_v57 = vmul.f32 0.14759426, %v2730_v5 }
  0x9d   :  { %2042 = vst.msk [vmem:[%s3267_s1 + $0x50] sm:$0xff] %vm2031_vm7, %v2009_v63  ;;  %v202_v18 = vmul.f32 0.1504663, %v2334_v1  ;;  %v266_v51 = vadd.f32 %v232_v56, %v2355_v16  ;;  %v267_v17 = vadd.f32 %v233_v12, %v2362_v19  ;;  %v121_v61 = vadd.f32 %v2733_v32, %v2722_v13 }
  0x9e   :  { %v203_v35 = vmul.f32 0.1504663, %v2339_v31  ;;  %v1802_v44 = vadd.f32 %v1708_v25, %v1658_v8  ;;  %v2753_v48 = vadd.f32 %v2736_v20, %v120_v55  ;;  %v2757_v34 = vmul.f32 0.13600498, %v2607_v38  ;;  %v3291_v31 = vld [vmem:[#allocation8_spill] sm:$0xff] }
  0x9f   :  { %v234_v53 = vadd.f32 %v202_v18, %v3288_v39  ;;  %v302_v1 = vadd.f32 %v266_v51, %v2442_v33  ;;  %v303_v16 = vadd.f32 %v267_v17, %v2448_v22  ;;  %v2762_v19 = vadd.f32 %v2744_v57, %v121_v61 }
  0xa0   :  { %3287 = vst [vmem:[#allocation2_spill] sm:$0xff] %v2753_v48  ;;  %v235_v11 = vadd.f32 %v203_v35, %v3290_v15  ;;  %v2010_v49 = vadd.f32 %v1916_v2, %v1802_v44  ;;  %v2767_v9 = vmul.f32 0.13600498, %v2682_v30  ;;  %v2770_v3 = vmul.f32 0.14116763, %v2719_v43  ;;  %v2783_v2 = vld [vmem:[%s3266_s0 + $0xd8] sm:$0xff] }
  0xa1   :  { %3289 = vst [vmem:[#allocation3_spill] sm:$0xff] %v2762_v19  ;;  %v268_v25 = vadd.f32 %v234_v53, %v3291_v31  ;;  %v340_v38 = vadd.f32 %v302_v1, %v2600_v40  ;;  %v341_v33 = vadd.f32 %v303_v16, %v2610_v23  ;;  %v2786_v29 = vmul.f32 0.14116763, %v2730_v5 }
  0xa2   :  { %v269_v22 = vadd.f32 %v235_v11, %v3292_v21  ;;  %2043 = vst.msk [vmem:[%s3267_s1 + $0x58] sm:$0xff] %vm2031_vm7, %v2010_v49  ;;  %v122_v23 = vadd.f32 %v2770_v3, %v2757_v34  ;;  %v2796_v58 = vmul.f32 0.14759426, %v2778_v54  ;;  %v2799_v28 = vmul.f32 0.14759426, %v2783_v2 }
  0xa3   :  { %v304_v40 = vadd.f32 %v268_v25, %v2557_v7  ;;  %v382_v63 = vrot.slane %v340_v38, 3  ;;  %v414_v59 = vrot.slane %v340_v38, 1  ;;  %v446_v56 = vrot.slane %v340_v38, 7 }
  0xa4   :  { %3293 = vst [vmem:[#allocation4_spill] sm:$0xff] %v2796_v58  ;;  %v507_v12 = vrot.slane %v340_v38, 5  ;;  %v508_v8 = vrot.slane %v341_v33, 5  ;;  %v591_v55 = vrot.slane %v341_v33, 3  ;;  %v623_v18 = vrot.slane %v341_v33, 1 }
  0xa5   :  { %v655_v51 = vrot.slane %v341_v33, 7  ;;  %v688_v17 = vsel %vm681_vm0, %v382_v63, %v414_v59  ;;  %v305_v7 = vadd.f32 %v269_v22, %v2560_v14  ;;  %v2803_v61 = vadd.f32 %v304_v40, %v60_v37 }
  0xa6   :  { %v2807_v35 = vadd.f32 %v2786_v29, %v2767_v9  ;;  %v509_v44 = vsel %vm488_vm1, %v507_v12, %v508_v8  ;;  %v705_v39 = vsel %vm698_vm2, %v688_v17, %v446_v56  ;;  %v737_v53 = vsel %vm488_vm1, %v508_v8, %v591_v55 }
  0xa7   :  { %v2813_v1 = vadd.f32 %v2796_v58, %v122_v23  ;;  %v721_v16 = vsel %vm488_vm1, %v705_v39, %v507_v12  ;;  %v754_v15 = vsel %vm747_vm3, %v737_v53, %v623_v18  ;;  %v794_v14 = vmul.f32 0.13600498, %v509_v44 }
  0xa8   :  { %v832_v37 = vmul.f32 0.14116763, %v509_v44  ;;  %v771_v11 = vsel %vm764_vm4, %v754_v15, %v655_v51  ;;  %v793_v49 = vmul.f32 0.13600498, %v721_v16  ;;  %v831_v31 = vmul.f32 0.14116763, %v721_v16 }
  0xa9   :  { %3294 = vst [vmem:[#allocation5_spill] sm:$0xff] %v2813_v1  ;;  %v1072_v25 = vmul.f32 0.14759426, %v721_v16  ;;  %v833_v38 = vmul.f32 0.14116763, %v771_v11 }
  0xaa   :  { %v941_v33 = vrot.slane %v832_v37, 1  ;;  %v1073_v21 = vmul.f32 0.14759426, %v509_v44  ;;  %v1710_v22 = vrot.slane %v832_v37, 5  ;;  %v940_v40 = vrot.slane %v831_v31, 1 }
  0xab   :  { %v1181_v63 = vrot.slane %v1072_v25, 2  ;;  %v1313_v59 = vmul.f32 0.1504663, %v721_v16  ;;  %v1314_v23 = vmul.f32 0.1504663, %v509_v44  ;;  %v943_v56 = vrot.slane %v833_v38, 1 }
  0xac   :  { %v1182_v8 = vrot.slane %v1073_v21, 2  ;;  %v1565_v12 = vrot.slane %v1072_v25, 4  ;;  %v1566_v55 = vrot.slane %v1073_v21, 4  ;;  %v942_v18 = vsel %vm909_vm5, %v940_v40, %v941_v33 }
  0xad   :  { %v1421_v17 = vrot.slane %v1313_v59, 3  ;;  %v1422_v39 = vrot.slane %v1314_v23, 3  ;;  %v1709_v51 = vrot.slane %v831_v31, 5  ;;  %v944_v53 = vsel %vm909_vm5, %v941_v33, %v943_v56 }
  0xae   :  { %v1034_v15 = vadd.f32 %v942_v18, %v793_v49  ;;  %v1183_v1 = vsel %vm1150_vm6, %v1181_v63, %v1182_v8  ;;  %v1567_v37 = vsel %vm747_vm3, %v1565_v12, %v1566_v55  ;;  %v1035_v19 = vadd.f32 %v944_v53, %v794_v14 }
  0xaf   :  { %v1423_v16 = vsel %vm764_vm4, %v1421_v17, %v1422_v39  ;;  %v1711_v44 = vsel %vm488_vm1, %v1709_v51, %v1710_v22  ;;  %v1917_v48 = vrot.slane %v793_v49, 6  ;;  %v1918_v21 = vrot.slane %v794_v14, 6 }
  0xb0   :  { %v1275_v25 = vadd.f32 %v1183_v1, %v1034_v15  ;;  %v1074_v58 = vmul.f32 0.14759426, %v771_v11  ;;  %v1315_v40 = vmul.f32 0.1504663, %v771_v11  ;;  %v1712_v59 = vrot.slane %v833_v38, 5 }
  0xb1   :  { %v1829_v23 = vmul.f32 0.13600498, %v771_v11  ;;  %v343_v31 = vadd.f32 %v305_v7, %v2722_v13  ;;  %v383_v33 = vrot.slane %v2803_v61, 3  ;;  %v1919_v63 = vsel %vm698_vm2, %v1917_v48, %v1918_v21 }
  0xb2   :  { %v1515_v56 = vadd.f32 %v1423_v16, %v1275_v25  ;;  %v1184_v12 = vrot.slane %v1074_v58, 2  ;;  %v1424_v18 = vrot.slane %v1315_v40, 3  ;;  %v1568_v53 = vrot.slane %v1074_v58, 4 }
  0xb3   :  { %v1713_v17 = vsel %vm488_vm1, %v1710_v22, %v1712_v59  ;;  %v1920_v51 = vrot.slane %v1829_v23, 6  ;;  %v415_v1 = vrot.slane %v2803_v61, 1  ;;  %v447_v13 = vrot.slane %v2803_v61, 7 }
  0xb4   :  { %v1659_v14 = vadd.f32 %v1567_v37, %v1515_v56  ;;  %v1185_v49 = vsel %vm1150_vm6, %v1182_v8, %v1184_v12  ;;  %v1425_v11 = vsel %vm764_vm4, %v1422_v39, %v1424_v18  ;;  %v1569_v38 = vsel %vm747_vm3, %v1566_v55, %v1568_v53 }
  0xb5   :  { %v1276_v7 = vadd.f32 %v1185_v49, %v1035_v19  ;;  %v1921_v48 = vsel %vm698_vm2, %v1918_v21, %v1920_v51  ;;  %v510_v15 = vrot.slane %v2803_v61, 5  ;;  %v511_v16 = vrot.slane %v343_v31, 5 }
  0xb6   :  { %v1803_v58 = vadd.f32 %v1711_v44, %v1659_v14  ;;  %v592_v22 = vrot.slane %v343_v31, 3  ;;  %v624_v25 = vrot.slane %v343_v31, 1  ;;  %v656_v59 = vrot.slane %v343_v31, 7 }
  0xb7   :  { %v1516_v40 = vadd.f32 %v1425_v11, %v1276_v7  ;;  %v689_v37 = vsel %vm681_vm0, %v383_v33, %v415_v1  ;;  %v2838_v8 = vadd.f32 %v2799_v28, %v2807_v35  ;;  %v512_v19 = vsel %vm488_vm1, %v510_v15, %v511_v16 }
  0xb8   :  { %v2011_v39 = vadd.f32 %v1919_v63, %v1803_v58  ;;  %v706_v55 = vsel %vm698_vm2, %v689_v37, %v447_v13  ;;  %v738_v21 = vsel %vm488_vm1, %v511_v16, %v592_v22  ;;  %v796_v56 = vmul.f32 0.13600498, %v512_v19 }
  0xb9   :  { %v1660_v61 = vadd.f32 %v1569_v38, %v1516_v40  ;;  %v722_v44 = vsel %vm488_vm1, %v706_v55, %v510_v15  ;;  %v755_v23 = vsel %vm747_vm3, %v738_v21, %v624_v25  ;;  %v835_v63 = vmul.f32 0.14116763, %v512_v19 }
  0xba   :  { %2044 = vst.msk [vmem:[%s3267_s1 + $0x60] sm:$0xff] %vm2031_vm7, %v2011_v39  ;;  %v772_v35 = vsel %vm764_vm4, %v755_v23, %v656_v59  ;;  %v795_v31 = vmul.f32 0.13600498, %v722_v44  ;;  %v834_v33 = vmul.f32 0.14116763, %v722_v44  ;;  %v1923_v23 = vrot.slane %v796_v56, 6 }
  0xbb   :  { %v1804_v12 = vadd.f32 %v1713_v17, %v1660_v61  ;;  %v836_v18 = vmul.f32 0.14116763, %v772_v35  ;;  %v1075_v53 = vmul.f32 0.14759426, %v722_v44  ;;  %v1076_v51 = vmul.f32 0.14759426, %v512_v19 }
  0xbc   :  { %v945_v1 = vrot.slane %v834_v33, 1  ;;  %v946_v14 = vrot.slane %v835_v63, 1  ;;  %v1316_v49 = vmul.f32 0.1504663, %v722_v44  ;;  %v1317_v11 = vmul.f32 0.1504663, %v512_v19 }
  0xbd   :  { %v2012_v13 = vadd.f32 %v1921_v48, %v1804_v12  ;;  %v948_v7 = vrot.slane %v836_v18, 1  ;;  %v1186_v38 = vrot.slane %v1075_v53, 2  ;;  %v1187_v15 = vrot.slane %v1076_v51, 2 }
  0xbe   :  { %v947_v58 = vsel %vm909_vm5, %v945_v1, %v946_v14  ;;  %v1426_v16 = vrot.slane %v1316_v49, 3  ;;  %v1427_v22 = vrot.slane %v1317_v11, 3  ;;  %v1570_v25 = vrot.slane %v1075_v53, 4 }
  0xbf   :  { %2045 = vst.msk [vmem:[%s3267_s1 + $0x68] sm:$0xff] %vm2031_vm7, %v2012_v13  ;;  %v949_v17 = vsel %vm909_vm5, %v946_v14, %v948_v7  ;;  %v1036_v40 = vadd.f32 %v947_v58, %v795_v31  ;;  %v1188_v59 = vsel %vm1150_vm6, %v1186_v38, %v1187_v15  ;;  %v1571_v37 = vrot.slane %v1076_v51, 4  ;;  %v2070_v51 = vld [vmem:[%s3266_s0 + $0x80] sm:$0xff] }
  0xc0   :  { %v1037_v48 = vadd.f32 %v949_v17, %v796_v56  ;;  %v1428_v39 = vsel %vm764_vm4, %v1426_v16, %v1427_v22  ;;  %v1714_v19 = vrot.slane %v834_v33, 5  ;;  %v1715_v55 = vrot.slane %v835_v63, 5 }
  0xc1   :  { %v1277_v21 = vadd.f32 %v1188_v59, %v1036_v40  ;;  %v1572_v61 = vsel %vm747_vm3, %v1570_v25, %v1571_v37  ;;  %v1922_v44 = vrot.slane %v795_v31, 6  ;;  %v1077_v53 = vmul.f32 0.14759426, %v772_v35  ;;  %v3295_v25 = vld [vmem:[#allocation6_spill] sm:$0xff] }
  0xc2   :  { %v1716_v12 = vsel %vm488_vm1, %v1714_v19, %v1715_v55  ;;  %v1318_v1 = vmul.f32 0.1504663, %v772_v35  ;;  %v1717_v49 = vrot.slane %v836_v18, 5  ;;  %v1830_v13 = vmul.f32 0.13600498, %v772_v35  ;;  %v2071_v18 = vld [vmem:[%s3266_s0 + $0x88] sm:$0xff] }
  0xc3   :  { %v1517_v14 = vadd.f32 %v1428_v39, %v1277_v21  ;;  %v1924_v11 = vsel %vm698_vm2, %v1922_v44, %v1923_v23  ;;  %v204_v33 = vmul.f32 0.1504663, %v2070_v51  ;;  %v1189_v63 = vrot.slane %v1077_v53, 2  ;;  %v3298_v51 = vld [vmem:[#allocation11_spill] sm:$0xff] }
  0xc4   :  { %v1429_v7 = vrot.slane %v1318_v1, 3  ;;  %v1573_v38 = vrot.slane %v1077_v53, 4  ;;  %v1718_v31 = vsel %vm488_vm1, %v1715_v55, %v1717_v49  ;;  %v1925_v58 = vrot.slane %v1830_v13, 6 }
  0xc5   :  { %v1661_v56 = vadd.f32 %v1572_v61, %v1517_v14  ;;  %v205_v16 = vmul.f32 0.1504663, %v2071_v18  ;;  %v236_v17 = vadd.f32 %v204_v33, %v3295_v25  ;;  %v1190_v35 = vsel %vm1150_vm6, %v1187_v15, %v1189_v63  ;;  %v3296_v61 = vld [vmem:[#allocation7_spill] sm:$0xff] }
  0xc6   :  { %v1430_v40 = vsel %vm764_vm4, %v1427_v22, %v1429_v7  ;;  %v1574_v59 = vsel %vm747_vm3, %v1571_v37, %v1573_v38  ;;  %v2873_v39 = vmul.f32 0.13600498, %v2719_v43  ;;  %v1278_v55 = vadd.f32 %v1190_v35, %v1037_v48 }
  0xc7   :  { %v1805_v19 = vadd.f32 %v1716_v12, %v1661_v56  ;;  %v1926_v21 = vsel %vm698_vm2, %v1923_v23, %v1925_v58  ;;  %v237_v44 = vadd.f32 %v205_v16, %v3296_v61  ;;  %v270_v53 = vadd.f32 %v236_v17, %v2525_v45  ;;  %v3297_v23 = vld [vmem:[#allocation10_spill] sm:$0xff] }
  0xc8   :  { %v2879_v1 = vmul.f32 0.13600498, %v2730_v5  ;;  %v206_v15 = vmul.f32 0.1504663, %v2514_v6  ;;  %v207_v22 = vmul.f32 0.1504663, %v2519_v52  ;;  %v1518_v37 = vadd.f32 %v1430_v40, %v1278_v55 }
  0xc9   :  { %v2013_v49 = vadd.f32 %v1924_v11, %v1805_v19  ;;  %v271_v14 = vadd.f32 %v237_v44, %v2531_v36  ;;  %v208_v12 = vmul.f32 0.1504663, %v2554_v24  ;;  %v306_v48 = vadd.f32 %v270_v53, %v2613_v46 }
  0xca   :  { %v238_v13 = vadd.f32 %v206_v15, %v3297_v23  ;;  %v239_v33 = vadd.f32 %v207_v22, %v3298_v51  ;;  %v209_v45 = vmul.f32 0.1504663, %v2585_v0  ;;  %v1662_v6 = vadd.f32 %v1574_v59, %v1518_v37  ;;  %v3299_v0 = vld [vmem:[#allocation12_spill] sm:$0xff] }
  0xcb   :  { %2046 = vst.msk [vmem:[%s3267_s1 + $0x70] sm:$0xff] %vm2031_vm7, %v2013_v49  ;;  %v307_v52 = vadd.f32 %v271_v14, %v2622_v10  ;;  %v240_v36 = vadd.f32 %v208_v12, %v2541_v47  ;;  %v2896_v24 = vmul.f32 0.13600498, %v2778_v54  ;;  %v344_v46 = vadd.f32 %v306_v48, %v2757_v34 }
  0xcc   :  { %v272_v11 = vadd.f32 %v238_v13, %v2570_v26  ;;  %v273_v63 = vadd.f32 %v239_v33, %v2594_v4  ;;  %v241_v7 = vadd.f32 %v209_v45, %v3299_v0  ;;  %v1806_v38 = vadd.f32 %v1718_v31, %v1662_v6 }
  0xcd   :  { %v345_v56 = vadd.f32 %v307_v52, %v2767_v9  ;;  %v2904_v58 = vadd.f32 %v240_v36, %v2625_v41  ;;  %v2907_v10 = vmul.f32 0.13600498, %v2783_v2  ;;  %v384_v47 = vrot.slane %v344_v46, 3 }
  0xce   :  { %v416_v18 = vrot.slane %v344_v46, 1  ;;  %v448_v16 = vrot.slane %v344_v46, 7  ;;  %v513_v25 = vrot.slane %v344_v46, 5  ;;  %v2014_v34 = vadd.f32 %v1926_v21, %v1806_v38 }
  0xcf   :  { %v514_v17 = vrot.slane %v345_v56, 5  ;;  %v593_v26 = vrot.slane %v345_v56, 3  ;;  %v625_v35 = vrot.slane %v345_v56, 1  ;;  %v657_v4 = vrot.slane %v345_v56, 7 }
  0xd0   :  { %v690_v40 = vsel %vm681_vm0, %v384_v47, %v416_v18  ;;  %v308_v31 = vadd.f32 %v272_v11, %v2725_v27  ;;  %v309_v9 = vadd.f32 %v273_v63, %v2733_v32  ;;  %2047 = vst.msk [vmem:[%s3267_s1 + $0x78] sm:$0xff] %vm2031_vm7, %v2014_v34  ;;  %v2920_v55 = vadd.f32 %v241_v7, %v2686_v50 }
  0xd1   :  { %v515_v41 = vsel %vm488_vm1, %v513_v25, %v514_v17  ;;  %v707_v59 = vsel %vm698_vm2, %v690_v40, %v448_v16  ;;  %v739_v19 = vsel %vm488_vm1, %v514_v17, %v593_v26 }
  0xd2   :  { %v723_v21 = vsel %vm488_vm1, %v707_v59, %v513_v25  ;;  %v756_v27 = vsel %vm747_vm3, %v739_v19, %v625_v35  ;;  %v798_v61 = vmul.f32 0.13600498, %v515_v41  ;;  %v838_v32 = vmul.f32 0.14116763, %v515_v41 }
  0xd3   :  { %v773_v44 = vsel %vm764_vm4, %v756_v27, %v657_v4  ;;  %v797_v53 = vmul.f32 0.13600498, %v723_v21  ;;  %v837_v15 = vmul.f32 0.14116763, %v723_v21  ;;  %v1078_v22 = vmul.f32 0.14759426, %v723_v21 }
  0xd4   :  { %v839_v49 = vmul.f32 0.14116763, %v773_v44  ;;  %v951_v37 = vrot.slane %v838_v32, 1  ;;  %v1079_v14 = vmul.f32 0.14759426, %v515_v41  ;;  %v1720_v12 = vrot.slane %v838_v32, 5 }
  0xd5   :  { %v950_v48 = vrot.slane %v837_v15, 1  ;;  %v1191_v23 = vrot.slane %v1078_v22, 2  ;;  %v1319_v13 = vmul.f32 0.1504663, %v723_v21  ;;  %v1320_v50 = vmul.f32 0.1504663, %v515_v41 }
  0xd6   :  { %v953_v51 = vrot.slane %v839_v49, 1  ;;  %v1192_v33 = vrot.slane %v1079_v14, 2  ;;  %v1575_v45 = vrot.slane %v1078_v22, 4  ;;  %v1576_v6 = vrot.slane %v1079_v14, 4 }
  0xd7   :  { %v952_v52 = vsel %vm909_vm5, %v950_v48, %v951_v37  ;;  %v1431_v36 = vrot.slane %v1319_v13, 3  ;;  %v1432_v46 = vrot.slane %v1320_v50, 3  ;;  %v1719_v11 = vrot.slane %v837_v15, 5 }
  0xd8   :  { %v954_v63 = vsel %vm909_vm5, %v951_v37, %v953_v51  ;;  %v1038_v0 = vadd.f32 %v952_v52, %v797_v53  ;;  %v1193_v7 = vsel %vm1150_vm6, %v1191_v23, %v1192_v33  ;;  %v1577_v38 = vsel %vm747_vm3, %v1575_v45, %v1576_v6 }
  0xd9   :  { %v1039_v56 = vadd.f32 %v954_v63, %v798_v61  ;;  %v1433_v47 = vsel %vm764_vm4, %v1431_v36, %v1432_v46  ;;  %v1721_v18 = vsel %vm488_vm1, %v1719_v11, %v1720_v12  ;;  %v1927_v16 = vrot.slane %v797_v53, 6 }
  0xda   :  { %v1279_v25 = vadd.f32 %v1193_v7, %v1038_v0  ;;  %v1928_v34 = vrot.slane %v798_v61, 6  ;;  %v1080_v17 = vmul.f32 0.14759426, %v773_v44  ;;  %v1321_v26 = vmul.f32 0.1504663, %v773_v44 }
  0xdb   :  { %v1722_v35 = vrot.slane %v839_v49, 5  ;;  %v1831_v4 = vmul.f32 0.13600498, %v773_v44  ;;  %v346_v40 = vadd.f32 %v308_v31, %v2873_v39  ;;  %v347_v41 = vadd.f32 %v309_v9, %v2879_v1 }
  0xdc   :  { %v1519_v59 = vadd.f32 %v1433_v47, %v1279_v25  ;;  %v1929_v19 = vsel %vm698_vm2, %v1927_v16, %v1928_v34  ;;  %v1194_v21 = vrot.slane %v1080_v17, 2  ;;  %v1434_v27 = vrot.slane %v1321_v26, 3 }
  0xdd   :  { %v1578_v32 = vrot.slane %v1080_v17, 4  ;;  %v1723_v15 = vsel %vm488_vm1, %v1720_v12, %v1722_v35  ;;  %v1930_v22 = vrot.slane %v1831_v4, 6  ;;  %v385_v53 = vrot.slane %v346_v40, 3 }
  0xde   :  { %v1663_v37 = vadd.f32 %v1577_v38, %v1519_v59  ;;  %v1195_v61 = vsel %vm1150_vm6, %v1192_v33, %v1194_v21  ;;  %v1435_v49 = vsel %vm764_vm4, %v1432_v46, %v1434_v27  ;;  %v417_v44 = vrot.slane %v346_v40, 1 }
  0xdf   :  { %v1280_v14 = vadd.f32 %v1195_v61, %v1039_v56  ;;  %v1579_v31 = vsel %vm747_vm3, %v1576_v6, %v1578_v32  ;;  %v1931_v9 = vsel %vm698_vm2, %v1928_v34, %v1930_v22  ;;  %v449_v48 = vrot.slane %v346_v40, 7 }
  0xe0   :  { %v1807_v23 = vadd.f32 %v1721_v18, %v1663_v37  ;;  %v516_v13 = vrot.slane %v346_v40, 5  ;;  %v517_v50 = vrot.slane %v347_v41, 5  ;;  %v594_v51 = vrot.slane %v347_v41, 3 }
  0xe1   :  { %v1520_v45 = vadd.f32 %v1435_v49, %v1280_v14  ;;  %v626_v12 = vrot.slane %v347_v41, 1  ;;  %v658_v52 = vrot.slane %v347_v41, 7  ;;  %v691_v36 = vsel %vm681_vm0, %v385_v53, %v417_v44 }
  0xe2   :  { %v2015_v11 = vadd.f32 %v1929_v19, %v1807_v23  ;;  %v518_v33 = vsel %vm488_vm1, %v516_v13, %v517_v50  ;;  %v708_v46 = vsel %vm698_vm2, %v691_v36, %v449_v48  ;;  %v740_v63 = vsel %vm488_vm1, %v517_v50, %v594_v51 }
  0xe3   :  { %v1664_v6 = vadd.f32 %v1579_v31, %v1520_v45  ;;  %v724_v0 = vsel %vm488_vm1, %v708_v46, %v516_v13  ;;  %v757_v7 = vsel %vm747_vm3, %v740_v63, %v626_v12  ;;  %v800_v38 = vmul.f32 0.13600498, %v518_v33 }
  0xe4   :  { %2048 = vst.msk [vmem:[%s3267_s1 + $0x80] sm:$0xff] %vm2031_vm7, %v2015_v11  ;;  %v774_v56 = vsel %vm764_vm4, %v757_v7, %v658_v52  ;;  %v799_v47 = vmul.f32 0.13600498, %v724_v0  ;;  %v840_v18 = vmul.f32 0.14116763, %v724_v0  ;;  %v310_v63 = vadd.f32 %v2904_v58, %v2770_v3 }
  0xe5   :  { %v841_v16 = vmul.f32 0.14116763, %v518_v33  ;;  %v1808_v25 = vadd.f32 %v1723_v15, %v1664_v6  ;;  %v842_v34 = vmul.f32 0.14116763, %v774_v56  ;;  %v1081_v17 = vmul.f32 0.14759426, %v724_v0 }
  0xe6   :  { %v1082_v26 = vmul.f32 0.14759426, %v518_v33  ;;  %v955_v35 = vrot.slane %v840_v18, 1  ;;  %v1322_v40 = vmul.f32 0.1504663, %v724_v0  ;;  %v1932_v50 = vrot.slane %v799_v47, 6 }
  0xe7   :  { %v956_v4 = vrot.slane %v841_v16, 1  ;;  %v1323_v41 = vmul.f32 0.1504663, %v518_v33  ;;  %v2016_v59 = vadd.f32 %v1931_v9, %v1808_v25  ;;  %v958_v19 = vrot.slane %v842_v34, 1 }
  0xe8   :  { %v1196_v21 = vrot.slane %v1081_v17, 2  ;;  %v1197_v27 = vrot.slane %v1082_v26, 2  ;;  %v1436_v22 = vrot.slane %v1322_v40, 3  ;;  %v1580_v37 = vrot.slane %v1081_v17, 4 }
  0xe9   :  { %v957_v32 = vsel %vm909_vm5, %v955_v35, %v956_v4  ;;  %v1437_v53 = vrot.slane %v1323_v41, 3  ;;  %2049 = vst.msk [vmem:[%s3267_s1 + $0x88] sm:$0xff] %vm2031_vm7, %v2016_v59  ;;  %v959_v15 = vsel %vm909_vm5, %v956_v4, %v958_v19  ;;  %v1581_v44 = vrot.slane %v1082_v26, 4 }
  0xea   :  { %v1040_v61 = vadd.f32 %v957_v32, %v799_v47  ;;  %v1198_v49 = vsel %vm1150_vm6, %v1196_v21, %v1197_v27  ;;  %v1041_v14 = vadd.f32 %v959_v15, %v800_v38  ;;  %v1724_v9 = vrot.slane %v840_v18, 5 }
  0xeb   :  { %v1438_v31 = vsel %vm764_vm4, %v1436_v22, %v1437_v53  ;;  %v1725_v48 = vrot.slane %v841_v16, 5  ;;  %v1582_v13 = vsel %vm747_vm3, %v1580_v37, %v1581_v44  ;;  %v1933_v51 = vrot.slane %v800_v38, 6 }
  0xec   :  { %v1281_v23 = vadd.f32 %v1198_v49, %v1040_v61  ;;  %v1083_v12 = vmul.f32 0.14759426, %v774_v56  ;;  %v1324_v52 = vmul.f32 0.1504663, %v774_v56  ;;  %v1727_v36 = vrot.slane %v842_v34, 5 }
  0xed   :  { %v1726_v45 = vsel %vm488_vm1, %v1724_v9, %v1725_v48  ;;  %v1934_v33 = vsel %vm698_vm2, %v1932_v50, %v1933_v51  ;;  %v1832_v46 = vmul.f32 0.13600498, %v774_v56  ;;  %v311_v38 = vadd.f32 %v2920_v55, %v2786_v29 }
  0xee   :  { %v1521_v11 = vadd.f32 %v1438_v31, %v1281_v23  ;;  %v1199_v6 = vrot.slane %v1083_v12, 2  ;;  %v1439_v0 = vrot.slane %v1324_v52, 3  ;;  %v1583_v7 = vrot.slane %v1083_v12, 4 }
  0xef   :  { %v1728_v18 = vsel %vm488_vm1, %v1725_v48, %v1727_v36  ;;  %v1935_v47 = vrot.slane %v1832_v46, 6  ;;  %v348_v25 = vadd.f32 %v2896_v24, %v310_v63  ;;  %v2971_v3 = vmul.f32 0.14116763, %v2778_v54 }
  0xf0   :  { %v1665_v16 = vadd.f32 %v1582_v13, %v1521_v11  ;;  %v1200_v34 = vsel %vm1150_vm6, %v1197_v27, %v1199_v6  ;;  %v1440_v17 = vsel %vm764_vm4, %v1437_v53, %v1439_v0  ;;  %v1584_v56 = vsel %vm747_vm3, %v1581_v44, %v1583_v7 }
  0xf1   :  { %v1282_v26 = vadd.f32 %v1200_v34, %v1041_v14  ;;  %v1936_v35 = vsel %vm698_vm2, %v1933_v51, %v1935_v47  ;;  %v349_v4 = vadd.f32 %v2907_v10, %v311_v38  ;;  %v386_v40 = vrot.slane %v348_v25, 3 }
  0xf2   :  { %v1809_v58 = vadd.f32 %v1726_v45, %v1665_v16  ;;  %v418_v41 = vrot.slane %v348_v25, 1  ;;  %v450_v29 = vrot.slane %v348_v25, 7  ;;  %v519_v55 = vrot.slane %v348_v25, 5 }
  0xf3   :  { %v1522_v19 = vadd.f32 %v1440_v17, %v1282_v26  ;;  %v520_v21 = vrot.slane %v349_v4, 5  ;;  %v595_v27 = vrot.slane %v349_v4, 3  ;;  %v627_v32 = vrot.slane %v349_v4, 1 }
  0xf4   :  { %v2017_v59 = vadd.f32 %v1934_v33, %v1809_v58  ;;  %v659_v22 = vrot.slane %v349_v4, 7  ;;  %v692_v53 = vsel %vm681_vm0, %v386_v40, %v418_v41  ;;  %v2977_v37 = vmul.f32 0.14116763, %v2783_v2 }
  0xf5   :  { %v1666_v15 = vadd.f32 %v1584_v56, %v1522_v19  ;;  %v521_v61 = vsel %vm488_vm1, %v519_v55, %v520_v21  ;;  %v709_v49 = vsel %vm698_vm2, %v692_v53, %v450_v29  ;;  %v741_v44 = vsel %vm488_vm1, %v520_v21, %v595_v27 }
  0xf6   :  { %2050 = vst.msk [vmem:[%s3267_s1 + $0x90] sm:$0xff] %vm2031_vm7, %v2017_v59  ;;  %v725_v14 = vsel %vm488_vm1, %v709_v49, %v519_v55  ;;  %v758_v31 = vsel %vm747_vm3, %v741_v44, %v627_v32  ;;  %v802_v9 = vmul.f32 0.13600498, %v521_v61  ;;  %v844_v48 = vmul.f32 0.14116763, %v521_v61 }
  0xf7   :  { %v1810_v23 = vadd.f32 %v1728_v18, %v1666_v15  ;;  %v775_v13 = vsel %vm764_vm4, %v758_v31, %v659_v22  ;;  %v801_v50 = vmul.f32 0.13600498, %v725_v14  ;;  %v843_v51 = vmul.f32 0.14116763, %v725_v14 }
  0xf8   :  { %v845_v45 = vmul.f32 0.14116763, %v775_v13  ;;  %v961_v12 = vrot.slane %v844_v48, 1  ;;  %v1084_v52 = vmul.f32 0.14759426, %v725_v14  ;;  %v1730_v36 = vrot.slane %v844_v48, 5 }
  0xf9   :  { %v2018_v11 = vadd.f32 %v1936_v35, %v1810_v23  ;;  %v960_v33 = vrot.slane %v843_v51, 1  ;;  %v1085_v46 = vmul.f32 0.14759426, %v521_v61  ;;  %v1325_v63 = vmul.f32 0.1504663, %v725_v14 }
  0xfa   :  { %v963_v6 = vrot.slane %v845_v45, 1  ;;  %v1201_v0 = vrot.slane %v1084_v52, 2  ;;  %v1326_v7 = vmul.f32 0.1504663, %v521_v61  ;;  %v1585_v16 = vrot.slane %v1084_v52, 4  ;;  %v2072_v61 = vld [vmem:[%s3266_s0 + $0xb0] sm:$0xff] }
  0xfb   :  { %2051 = vst.msk [vmem:[%s3267_s1 + $0x98] sm:$0xff] %vm2031_vm7, %v2018_v11  ;;  %v962_v18 = vsel %vm909_vm5, %v960_v33, %v961_v12  ;;  %v1202_v47 = vrot.slane %v1085_v46, 2  ;;  %v1441_v38 = vrot.slane %v1325_v63, 3  ;;  %v1586_v25 = vrot.slane %v1085_v46, 4 }
  0xfc   :  { %v964_v34 = vsel %vm909_vm5, %v961_v12, %v963_v6  ;;  %v1042_v17 = vadd.f32 %v962_v18, %v801_v50  ;;  %v1442_v56 = vrot.slane %v1326_v7, 3  ;;  %v1729_v58 = vrot.slane %v843_v51, 5  ;;  %v3025_v6 = vld [vmem:[%s3266_s0 + $0xe8] sm:$0xff] }
  0xfd   :  { %v1043_v26 = vadd.f32 %v964_v34, %v802_v9  ;;  %v1203_v35 = vsel %vm1150_vm6, %v1201_v0, %v1202_v47  ;;  %v1587_v4 = vsel %vm747_vm3, %v1585_v16, %v1586_v25  ;;  %v1937_v40 = vrot.slane %v801_v50, 6  ;;  %v3011_v50 = vld [vmem:[%s3266_s0 + $0xe0] sm:$0xff] }
  0xfe   :  { %v1283_v41 = vadd.f32 %v1203_v35, %v1042_v17  ;;  %v1443_v29 = vsel %vm764_vm4, %v1441_v38, %v1442_v56  ;;  %v1731_v55 = vsel %vm488_vm1, %v1729_v58, %v1730_v36  ;;  %v1938_v59 = vrot.slane %v802_v9, 6 }
  0xff   :  { %v1086_v19 = vmul.f32 0.14759426, %v775_v13  ;;  %v1327_v21 = vmul.f32 0.1504663, %v775_v13  ;;  %v1732_v27 = vrot.slane %v845_v45, 5  ;;  %v3001_v32 = vadd.f32 %v2971_v3, %v2873_v39 }
 0x100   :  { %v1523_v22 = vadd.f32 %v1443_v29, %v1283_v41  ;;  %v1939_v53 = vsel %vm698_vm2, %v1937_v40, %v1938_v59  ;;  %v1833_v15 = vmul.f32 0.13600498, %v775_v13  ;;  %v210_v49 = vmul.f32 0.1504663, %v2072_v61  ;;  %v3300_v13 = vld [vmem:[#allocation13_spill] sm:$0xff] }
 0x101   :  { %v1204_v44 = vrot.slane %v1086_v19, 2  ;;  %v1444_v14 = vrot.slane %v1327_v21, 3  ;;  %v1588_v31 = vrot.slane %v1086_v19, 4  ;;  %v1733_v9 = vsel %vm488_vm1, %v1730_v36, %v1732_v27 }
 0x102   :  { %v1667_v48 = vadd.f32 %v1587_v4, %v1523_v22  ;;  %v1940_v23 = vrot.slane %v1833_v15, 6  ;;  %v211_v51 = vmul.f32 0.1504663, %v2682_v30  ;;  %v242_v45 = vadd.f32 %v210_v49, %v3300_v13 }
 0x103   :  { %v1205_v12 = vsel %vm1150_vm6, %v1202_v47, %v1204_v44  ;;  %v1445_v52 = vsel %vm764_vm4, %v1442_v56, %v1444_v14  ;;  %v1589_v11 = vsel %vm747_vm3, %v1586_v25, %v1588_v31  ;;  %v3019_v33 = vmul.f32 0.13600498, %v3011_v50 }
 0x104   :  { %v1811_v36 = vadd.f32 %v1731_v55, %v1667_v48  ;;  %v1284_v46 = vadd.f32 %v1205_v12, %v1043_v26  ;;  %v1941_v63 = vsel %vm698_vm2, %v1938_v59, %v1940_v23  ;;  %v243_v30 = vadd.f32 %v211_v51, %v2691_v42  ;;  %v3042_v42 = vld [vmem:[%s3266_s0 + $0xf0] sm:$0xff] }
 0x105   :  { %v276_v0 = vadd.f32 %v242_v45, %v2736_v20  ;;  %v3030_v7 = vmul.f32 0.13600498, %v3025_v6  ;;  %v212_v16 = vmul.f32 0.1504663, %v2719_v43  ;;  %v213_v18 = vmul.f32 0.1504663, %v2730_v5 }
 0x106   :  { %v2019_v47 = vadd.f32 %v1939_v53, %v1811_v36  ;;  %v1524_v38 = vadd.f32 %v1445_v52, %v1284_v46  ;;  %v277_v25 = vadd.f32 %v243_v30, %v2744_v57  ;;  %v3036_v34 = vmul.f32 0.14116763, %v3011_v50  ;;  %v3047_v43 = vld [vmem:[%s3266_s0 + $0xf8] sm:$0xff] }
 0x107   :  { %v312_v17 = vadd.f32 %v276_v0, %v2971_v3  ;;  %v244_v5 = vadd.f32 %v212_v16, %v2703_v60  ;;  %v245_v20 = vadd.f32 %v213_v18, %v2707_v62  ;;  %v3052_v57 = vmul.f32 0.14116763, %v3025_v6  ;;  %v3301_v62 = vld [vmem:[#allocation4_spill] sm:$0xff] }
 0x108   :  { %2052 = vst.msk [vmem:[%s3267_s1 + $0xa0] sm:$0xff] %vm2031_vm7, %v2019_v47  ;;  %v1668_v56 = vadd.f32 %v1589_v11, %v1524_v38  ;;  %v313_v58 = vadd.f32 %v277_v25, %v2977_v37  ;;  %v3060_v26 = vmul.f32 0.13600498, %v3042_v42  ;;  %v3063_v35 = vmul.f32 0.13600498, %v3047_v43 }
 0x109   :  { %v350_v60 = vadd.f32 %v3019_v33, %v312_v17  ;;  %v278_v4 = vadd.f32 %v244_v5, %v3301_v62  ;;  %v279_v40 = vadd.f32 %v245_v20, %v2799_v28  ;;  %v3069_v41 = vmul.f32 0.14759426, %v3011_v50 }
 0x10a   :  { %v1812_v29 = vadd.f32 %v1733_v9, %v1668_v56  ;;  %v351_v55 = vadd.f32 %v3030_v7, %v313_v58  ;;  %v3073_v59 = vmul.f32 0.14759426, %v3025_v6  ;;  %v3076_v19 = vmul.f32 0.1504663, %v2778_v54 }
 0x10b   :  { %v387_v21 = vrot.slane %v350_v60, 3  ;;  %v419_v27 = vrot.slane %v350_v60, 1  ;;  %v451_v22 = vrot.slane %v350_v60, 7  ;;  %v522_v53 = vrot.slane %v350_v60, 5 }
 0x10c   :  { %v2020_v15 = vadd.f32 %v1941_v63, %v1812_v29  ;;  %v523_v61 = vrot.slane %v351_v55, 5  ;;  %v596_v49 = vrot.slane %v351_v55, 3  ;;  %v628_v28 = vrot.slane %v351_v55, 1 }
 0x10d   :  { %v660_v44 = vrot.slane %v351_v55, 7  ;;  %v693_v14 = vsel %vm681_vm0, %v387_v21, %v419_v27  ;;  %v314_v31 = vadd.f32 %v3036_v34, %v278_v4  ;;  %v315_v9 = vadd.f32 %v3052_v57, %v279_v40 }
 0x10e   :  { %2053 = vst.msk [vmem:[%s3267_s1 + $0xa8] sm:$0xff] %vm2031_vm7, %v2020_v15  ;;  %v524_v54 = vsel %vm488_vm1, %v522_v53, %v523_v61  ;;  %v710_v48 = vsel %vm698_vm2, %v693_v14, %v451_v22  ;;  %v742_v23 = vsel %vm488_vm1, %v523_v61, %v596_v49  ;;  %v3089_v51 = vmul.f32 0.1504663, %v2783_v2 }
 0x10f   :  { %v726_v13 = vsel %vm488_vm1, %v710_v48, %v522_v53  ;;  %v759_v45 = vsel %vm747_vm3, %v742_v23, %v628_v28  ;;  %v804_v12 = vmul.f32 0.13600498, %v524_v54  ;;  %v847_v52 = vmul.f32 0.14116763, %v524_v54 }
 0x110   :  { %v776_v11 = vsel %vm764_vm4, %v759_v45, %v660_v44  ;;  %v803_v36 = vmul.f32 0.13600498, %v726_v13  ;;  %v846_v46 = vmul.f32 0.14116763, %v726_v13  ;;  %v1087_v63 = vmul.f32 0.14759426, %v726_v13 }
 0x111   :  { %v848_v30 = vmul.f32 0.14116763, %v776_v11  ;;  %v966_v0 = vrot.slane %v847_v52, 1  ;;  %v1088_v16 = vmul.f32 0.14759426, %v524_v54  ;;  %v1735_v18 = vrot.slane %v847_v52, 5 }
 0x112   :  { %v965_v47 = vrot.slane %v846_v46, 1  ;;  %v1206_v38 = vrot.slane %v1087_v63, 2  ;;  %v1328_v25 = vmul.f32 0.1504663, %v726_v13  ;;  %v1329_v2 = vmul.f32 0.1504663, %v524_v54 }
 0x113   :  { %v968_v17 = vrot.slane %v848_v30, 1  ;;  %v1207_v5 = vrot.slane %v1088_v16, 2  ;;  %v1590_v20 = vrot.slane %v1087_v63, 4  ;;  %v1591_v56 = vrot.slane %v1088_v16, 4 }
 0x114   :  { %v967_v58 = vsel %vm909_vm5, %v965_v47, %v966_v0  ;;  %v1446_v60 = vrot.slane %v1328_v25, 3  ;;  %v1447_v62 = vrot.slane %v1329_v2, 3  ;;  %v1734_v4 = vrot.slane %v846_v46, 5 }
 0x115   :  { %v969_v40 = vsel %vm909_vm5, %v966_v0, %v968_v17  ;;  %v1044_v29 = vadd.f32 %v967_v58, %v803_v36  ;;  %v1208_v55 = vsel %vm1150_vm6, %v1206_v38, %v1207_v5  ;;  %v1592_v21 = vsel %vm747_vm3, %v1590_v20, %v1591_v56 }
 0x116   :  { %v1045_v27 = vadd.f32 %v969_v40, %v804_v12  ;;  %v1448_v22 = vsel %vm764_vm4, %v1446_v60, %v1447_v62  ;;  %v1736_v53 = vsel %vm488_vm1, %v1734_v4, %v1735_v18  ;;  %v1942_v15 = vrot.slane %v803_v36, 6 }
 0x117   :  { %v1285_v61 = vadd.f32 %v1208_v55, %v1044_v29  ;;  %v1943_v49 = vrot.slane %v804_v12, 6  ;;  %v1089_v28 = vmul.f32 0.14759426, %v776_v11  ;;  %v1330_v44 = vmul.f32 0.1504663, %v776_v11 }
 0x118   :  { %v1737_v14 = vrot.slane %v848_v30, 5  ;;  %v1834_v54 = vmul.f32 0.13600498, %v776_v11  ;;  %v352_v48 = vadd.f32 %v3060_v26, %v314_v31  ;;  %v353_v23 = vadd.f32 %v3063_v35, %v315_v9 }
 0x119   :  { %v1525_v13 = vadd.f32 %v1448_v22, %v1285_v61  ;;  %v1944_v45 = vsel %vm698_vm2, %v1942_v15, %v1943_v49  ;;  %v1209_v52 = vrot.slane %v1089_v28, 2  ;;  %v1449_v46 = vrot.slane %v1330_v44, 3 }
 0x11a   :  { %v1593_v63 = vrot.slane %v1089_v28, 4  ;;  %v1738_v0 = vsel %vm488_vm1, %v1735_v18, %v1737_v14  ;;  %v1945_v16 = vrot.slane %v1834_v54, 6  ;;  %v388_v36 = vrot.slane %v352_v48, 3 }
 0x11b   :  { %v1669_v47 = vadd.f32 %v1592_v21, %v1525_v13  ;;  %v1210_v12 = vsel %vm1150_vm6, %v1207_v5, %v1209_v52  ;;  %v1450_v30 = vsel %vm764_vm4, %v1447_v62, %v1449_v46  ;;  %v420_v11 = vrot.slane %v352_v48, 1 }
 0x11c   :  { %v1286_v38 = vadd.f32 %v1210_v12, %v1045_v27  ;;  %v1594_v26 = vsel %vm747_vm3, %v1591_v56, %v1593_v63  ;;  %v1946_v35 = vsel %vm698_vm2, %v1943_v49, %v1945_v16  ;;  %v452_v31 = vrot.slane %v352_v48, 7 }
 0x11d   :  { %v1813_v9 = vadd.f32 %v1736_v53, %v1669_v47  ;;  %v525_v25 = vrot.slane %v352_v48, 5  ;;  %v526_v2 = vrot.slane %v353_v23, 5  ;;  %v597_v17 = vrot.slane %v353_v23, 3 }
 0x11e   :  { %v1526_v20 = vadd.f32 %v1450_v30, %v1286_v38  ;;  %v629_v18 = vrot.slane %v353_v23, 1  ;;  %v661_v58 = vrot.slane %v353_v23, 7  ;;  %v694_v60 = vsel %vm681_vm0, %v388_v36, %v420_v11 }
 0x11f   :  { %v2021_v4 = vadd.f32 %v1944_v45, %v1813_v9  ;;  %v527_v5 = vsel %vm488_vm1, %v525_v25, %v526_v2  ;;  %v711_v62 = vsel %vm698_vm2, %v694_v60, %v452_v31  ;;  %v743_v40 = vsel %vm488_vm1, %v526_v2, %v597_v17 }
 0x120   :  { %v1670_v56 = vadd.f32 %v1594_v26, %v1526_v20  ;;  %v727_v29 = vsel %vm488_vm1, %v711_v62, %v525_v25  ;;  %v760_v55 = vsel %vm747_vm3, %v743_v40, %v629_v18  ;;  %v806_v21 = vmul.f32 0.13600498, %v527_v5  ;;  %v3302_v40 = vld [vmem:[#allocation2_spill] sm:$0xff] }
 0x121   :  { %2054 = vst.msk [vmem:[%s3267_s1 + $0xb0] sm:$0xff] %vm2031_vm7, %v2021_v4  ;;  %v777_v27 = vsel %vm764_vm4, %v760_v55, %v661_v58  ;;  %v805_v22 = vmul.f32 0.13600498, %v727_v29  ;;  %v849_v53 = vmul.f32 0.14116763, %v727_v29 }
 0x122   :  { %v850_v15 = vmul.f32 0.14116763, %v527_v5  ;;  %v1814_v61 = vadd.f32 %v1738_v0, %v1670_v56  ;;  %v851_v49 = vmul.f32 0.14116763, %v777_v27  ;;  %v1090_v28 = vmul.f32 0.14759426, %v727_v29 }
 0x123   :  { %v1091_v44 = vmul.f32 0.14759426, %v527_v5  ;;  %v970_v14 = vrot.slane %v849_v53, 1  ;;  %v1331_v48 = vmul.f32 0.1504663, %v727_v29  ;;  %v1947_v2 = vrot.slane %v805_v22, 6 }
 0x124   :  { %v971_v54 = vrot.slane %v850_v15, 1  ;;  %v1332_v23 = vmul.f32 0.1504663, %v527_v5  ;;  %v2022_v13 = vadd.f32 %v1946_v35, %v1814_v61  ;;  %v973_v45 = vrot.slane %v851_v49, 1 }
 0x125   :  { %v1211_v52 = vrot.slane %v1090_v28, 2  ;;  %v1212_v46 = vrot.slane %v1091_v44, 2  ;;  %v1451_v16 = vrot.slane %v1331_v48, 3  ;;  %v1595_v47 = vrot.slane %v1090_v28, 4 }
 0x126   :  { %v972_v63 = vsel %vm909_vm5, %v970_v14, %v971_v54  ;;  %v1452_v36 = vrot.slane %v1332_v23, 3  ;;  %2055 = vst.msk [vmem:[%s3267_s1 + $0xb8] sm:$0xff] %vm2031_vm7, %v2022_v13  ;;  %v974_v0 = vsel %vm909_vm5, %v971_v54, %v973_v45  ;;  %v1596_v11 = vrot.slane %v1091_v44, 4 }
 0x127   :  { %v1046_v12 = vadd.f32 %v972_v63, %v805_v22  ;;  %v1213_v30 = vsel %vm1150_vm6, %v1211_v52, %v1212_v46  ;;  %v1047_v38 = vadd.f32 %v974_v0, %v806_v21  ;;  %v1739_v35 = vrot.slane %v849_v53, 5 }
 0x128   :  { %v1453_v26 = vsel %vm764_vm4, %v1451_v16, %v1452_v36  ;;  %v1740_v31 = vrot.slane %v850_v15, 5  ;;  %v1597_v25 = vsel %vm747_vm3, %v1595_v47, %v1596_v11  ;;  %v1948_v17 = vrot.slane %v806_v21, 6  ;;  %v3303_v21 = vld [vmem:[#allocation3_spill] sm:$0xff] }
 0x129   :  { %v1287_v9 = vadd.f32 %v1213_v30, %v1046_v12  ;;  %v1092_v18 = vmul.f32 0.14759426, %v777_v27  ;;  %v1333_v58 = vmul.f32 0.1504663, %v777_v27  ;;  %v1742_v60 = vrot.slane %v851_v49, 5  ;;  %v3304_v30 = vld [vmem:[#allocation5_spill] sm:$0xff] }
 0x12a   :  { %v1741_v20 = vsel %vm488_vm1, %v1739_v35, %v1740_v31  ;;  %v1949_v5 = vsel %vm698_vm2, %v1947_v2, %v1948_v17  ;;  %v1835_v62 = vmul.f32 0.13600498, %v777_v27  ;;  %v246_v56 = vadd.f32 %v3076_v19, %v3302_v40 }
 0x12b   :  { %v1527_v4 = vadd.f32 %v1453_v26, %v1287_v9  ;;  %v1214_v29 = vrot.slane %v1092_v18, 2  ;;  %v1454_v55 = vrot.slane %v1333_v58, 3  ;;  %v1598_v53 = vrot.slane %v1092_v18, 4 }
 0x12c   :  { %v1743_v15 = vsel %vm488_vm1, %v1740_v31, %v1742_v60  ;;  %v1950_v22 = vrot.slane %v1835_v62, 6  ;;  %v247_v28 = vadd.f32 %v3089_v51, %v3303_v21  ;;  %v280_v44 = vadd.f32 %v246_v56, %v3069_v41 }
 0x12d   :  { %v1671_v61 = vadd.f32 %v1597_v25, %v1527_v4  ;;  %v1215_v49 = vsel %vm1150_vm6, %v1212_v46, %v1214_v29  ;;  %v1455_v14 = vsel %vm764_vm4, %v1452_v36, %v1454_v55  ;;  %v1599_v27 = vsel %vm747_vm3, %v1596_v11, %v1598_v53 }
 0x12e   :  { %v288_v19 = vmul.f32 0.14116763, %v3042_v42  ;;  %v1288_v48 = vadd.f32 %v1215_v49, %v1047_v38  ;;  %v1951_v23 = vsel %vm698_vm2, %v1948_v17, %v1950_v22  ;;  %v281_v13 = vadd.f32 %v247_v28, %v3073_v59 }
 0x12f   :  { %v1815_v54 = vadd.f32 %v1741_v20, %v1671_v61  ;;  %v289_v45 = vmul.f32 0.14116763, %v3047_v43  ;;  %v216_v51 = vmul.f32 0.1504663, %v3011_v50  ;;  %v217_v63 = vmul.f32 0.1504663, %v3025_v6 }
 0x130   :  { %v316_v52 = vadd.f32 %v288_v19, %v280_v44  ;;  %v1528_v16 = vadd.f32 %v1455_v14, %v1288_v48  ;;  %v252_v36 = vmul.f32 0.14759426, %v3042_v42  ;;  %v253_v47 = vmul.f32 0.14759426, %v3047_v43 }
 0x131   :  { %v2023_v46 = vadd.f32 %v1949_v5, %v1815_v54  ;;  %v317_v0 = vadd.f32 %v289_v45, %v281_v13  ;;  %v248_v11 = vadd.f32 %v216_v51, %v3304_v30  ;;  %v249_v38 = vadd.f32 %v217_v63, %v2838_v8 }
 0x132   :  { %v354_v12 = vadd.f32 %v3019_v33, %v316_v52  ;;  %v1672_v50 = vadd.f32 %v1599_v27, %v1528_v16  ;;  %v125_v6 = vadd.f32 %v2977_v37, %v2879_v1  ;;  %v3158_v26 = vadd.f32 %v3069_v41, %v3001_v32 }
 0x133   :  { %2056 = vst.msk [vmem:[%s3267_s1 + $0xc0] sm:$0xff] %vm2031_vm7, %v2023_v46  ;;  %v3161_v35 = vmul.f32 0.1504663, %v3042_v42  ;;  %v355_v33 = vadd.f32 %v3030_v7, %v317_v0  ;;  %v282_v17 = vadd.f32 %v252_v36, %v248_v11  ;;  %v283_v20 = vadd.f32 %v253_v47, %v249_v38 }
 0x134   :  { %v389_v31 = vrot.slane %v354_v12, 3  ;;  %v421_v8 = vrot.slane %v354_v12, 1  ;;  %v453_v9 = vrot.slane %v354_v12, 7  ;;  %v1816_v25 = vadd.f32 %v1743_v15, %v1672_v50 }
 0x135   :  { %v528_v2 = vrot.slane %v354_v12, 5  ;;  %v529_v18 = vrot.slane %v355_v33, 5  ;;  %v598_v58 = vrot.slane %v355_v33, 3  ;;  %v630_v60 = vrot.slane %v355_v33, 1 }
 0x136   :  { %v662_v4 = vrot.slane %v355_v33, 7  ;;  %v2024_v5 = vadd.f32 %v1951_v23, %v1816_v25  ;;  %v695_v32 = vsel %vm681_vm0, %v389_v31, %v421_v8  ;;  %v318_v62 = vadd.f32 %v3036_v34, %v282_v17 }
 0x137   :  { %v319_v42 = vadd.f32 %v3052_v57, %v283_v20  ;;  %v530_v7 = vsel %vm488_vm1, %v528_v2, %v529_v18  ;;  %v712_v40 = vsel %vm698_vm2, %v695_v32, %v453_v9  ;;  %v744_v56 = vsel %vm488_vm1, %v529_v18, %v598_v58 }
 0x138   :  { %v3171_v29 = vadd.f32 %v3073_v59, %v125_v6  ;;  %2057 = vst.msk [vmem:[%s3267_s1 + $0xc8] sm:$0xff] %vm2031_vm7, %v2024_v5  ;;  %v728_v55 = vsel %vm488_vm1, %v712_v40, %v528_v2  ;;  %v761_v34 = vsel %vm747_vm3, %v744_v56, %v630_v60  ;;  %v808_v53 = vmul.f32 0.13600498, %v530_v7 }
 0x139   :  { %v853_v57 = vmul.f32 0.14116763, %v530_v7  ;;  %v778_v15 = vsel %vm764_vm4, %v761_v34, %v662_v4  ;;  %v807_v61 = vmul.f32 0.13600498, %v728_v55  ;;  %v852_v22 = vmul.f32 0.14116763, %v728_v55 }
 0x13a   :  { %v1093_v21 = vmul.f32 0.14759426, %v728_v55  ;;  %v854_v28 = vmul.f32 0.14116763, %v778_v15  ;;  %v1094_v49 = vmul.f32 0.14759426, %v530_v7  ;;  %v356_v2 = vadd.f32 %v2896_v24, %v318_v62 }
 0x13b   :  { %v976_v44 = vrot.slane %v853_v57, 1  ;;  %v1745_v14 = vrot.slane %v853_v57, 5  ;;  %v975_v27 = vrot.slane %v852_v22, 1  ;;  %v1334_v54 = vmul.f32 0.1504663, %v728_v55 }
 0x13c   :  { %v1216_v19 = vrot.slane %v1093_v21, 2  ;;  %v1335_v48 = vmul.f32 0.1504663, %v530_v7  ;;  %v978_v23 = vrot.slane %v854_v28, 1  ;;  %v1217_v13 = vrot.slane %v1094_v49, 2 }
 0x13d   :  { %v1600_v45 = vrot.slane %v1093_v21, 4  ;;  %v1601_v52 = vrot.slane %v1094_v49, 4  ;;  %v977_v51 = vsel %vm909_vm5, %v975_v27, %v976_v44  ;;  %v1456_v63 = vrot.slane %v1334_v54, 3 }
 0x13e   :  { %v1457_v46 = vrot.slane %v1335_v48, 3  ;;  %v1744_v16 = vrot.slane %v852_v22, 5  ;;  %v979_v36 = vsel %vm909_vm5, %v976_v44, %v978_v23  ;;  %v1048_v47 = vadd.f32 %v977_v51, %v807_v61 }
 0x13f   :  { %v1218_v0 = vsel %vm1150_vm6, %v1216_v19, %v1217_v13  ;;  %v1602_v12 = vsel %vm747_vm3, %v1600_v45, %v1601_v52  ;;  %v1049_v30 = vadd.f32 %v979_v36, %v808_v53  ;;  %v1952_v50 = vrot.slane %v807_v61, 6 }
 0x140   :  { %v1458_v11 = vsel %vm764_vm4, %v1456_v63, %v1457_v46  ;;  %v1746_v38 = vsel %vm488_vm1, %v1744_v16, %v1745_v14  ;;  %v1289_v6 = vadd.f32 %v1218_v0, %v1048_v47  ;;  %v1953_v33 = vrot.slane %v808_v53, 6 }
 0x141   :  { %v1095_v31 = vmul.f32 0.14759426, %v778_v15  ;;  %v1336_v8 = vmul.f32 0.1504663, %v778_v15  ;;  %v1747_v9 = vrot.slane %v854_v28, 5  ;;  %v357_v17 = vadd.f32 %v2907_v10, %v319_v42 }
 0x142   :  { %v1836_v25 = vmul.f32 0.13600498, %v778_v15  ;;  %v1529_v20 = vadd.f32 %v1458_v11, %v1289_v6  ;;  %v1954_v18 = vsel %vm698_vm2, %v1952_v50, %v1953_v33  ;;  %v390_v7 = vrot.slane %v356_v2, 3 }
 0x143   :  { %v1219_v58 = vrot.slane %v1095_v31, 2  ;;  %v1459_v60 = vrot.slane %v1336_v8, 3  ;;  %v1603_v4 = vrot.slane %v1095_v31, 4  ;;  %v1748_v5 = vsel %vm488_vm1, %v1745_v14, %v1747_v9 }
 0x144   :  { %v1955_v32 = vrot.slane %v1836_v25, 6  ;;  %v1673_v40 = vadd.f32 %v1602_v12, %v1529_v20  ;;  %v422_v34 = vrot.slane %v356_v2, 1  ;;  %v454_v62 = vrot.slane %v356_v2, 7 }
 0x145   :  { %v1220_v56 = vsel %vm1150_vm6, %v1217_v13, %v1219_v58  ;;  %v1460_v55 = vsel %vm764_vm4, %v1457_v46, %v1459_v60  ;;  %v1604_v24 = vsel %vm747_vm3, %v1601_v52, %v1603_v4  ;;  %v531_v57 = vrot.slane %v356_v2, 5 }
 0x146   :  { %v1290_v53 = vadd.f32 %v1220_v56, %v1049_v30  ;;  %v1956_v10 = vsel %vm698_vm2, %v1953_v33, %v1955_v32  ;;  %v1817_v42 = vadd.f32 %v1746_v38, %v1673_v40  ;;  %v532_v15 = vrot.slane %v357_v17, 5 }
 0x147   :  { %v599_v61 = vrot.slane %v357_v17, 3  ;;  %v631_v21 = vrot.slane %v357_v17, 1  ;;  %v663_v28 = vrot.slane %v357_v17, 7  ;;  %v696_v44 = vsel %vm681_vm0, %v390_v7, %v422_v34 }
 0x148   :  { %v1530_v22 = vadd.f32 %v1460_v55, %v1290_v53  ;;  %v2025_v49 = vadd.f32 %v1954_v18, %v1817_v42  ;;  %v533_v14 = vsel %vm488_vm1, %v531_v57, %v532_v15  ;;  %v713_v27 = vsel %vm698_vm2, %v696_v44, %v454_v62 }
 0x149   :  { %v745_v19 = vsel %vm488_vm1, %v532_v15, %v599_v61  ;;  %v729_v48 = vsel %vm488_vm1, %v713_v27, %v531_v57  ;;  %v810_v13 = vmul.f32 0.13600498, %v533_v14  ;;  %v856_v63 = vmul.f32 0.14116763, %v533_v14 }
 0x14a   :  { %v1674_v54 = vadd.f32 %v1604_v24, %v1530_v22  ;;  %v762_v23 = vsel %vm747_vm3, %v745_v19, %v631_v21  ;;  %2058 = vst.msk [vmem:[%s3267_s1 + $0xd0] sm:$0xff] %vm2031_vm7, %v2025_v49  ;;  %v809_v52 = vmul.f32 0.13600498, %v729_v48  ;;  %v855_v51 = vmul.f32 0.14116763, %v729_v48 }
 0x14b   :  { %v779_v45 = vsel %vm764_vm4, %v762_v23, %v663_v28  ;;  %v1096_v36 = vmul.f32 0.14759426, %v729_v48  ;;  %v1097_v47 = vmul.f32 0.14759426, %v533_v14  ;;  %v981_v12 = vrot.slane %v856_v63, 1 }
 0x14c   :  { %v1818_v46 = vadd.f32 %v1748_v5, %v1674_v54  ;;  %v857_v16 = vmul.f32 0.14116763, %v779_v45  ;;  %v980_v0 = vrot.slane %v855_v51, 1  ;;  %v1337_v30 = vmul.f32 0.1504663, %v729_v48 }
 0x14d   :  { %v1338_v11 = vmul.f32 0.1504663, %v533_v14  ;;  %v1221_v6 = vrot.slane %v1096_v36, 2  ;;  %v1222_v33 = vrot.slane %v1097_v47, 2  ;;  %v1605_v25 = vrot.slane %v1096_v36, 4 }
 0x14e   :  { %v2026_v38 = vadd.f32 %v1956_v10, %v1818_v46  ;;  %v983_v50 = vrot.slane %v857_v16, 1  ;;  %v982_v31 = vsel %vm909_vm5, %v980_v0, %v981_v12  ;;  %v1461_v8 = vrot.slane %v1337_v30, 3 }
 0x14f   :  { %v1462_v9 = vrot.slane %v1338_v11, 3  ;;  %v1050_v17 = vadd.f32 %v982_v31, %v809_v52  ;;  %v1223_v20 = vsel %vm1150_vm6, %v1221_v6, %v1222_v33  ;;  %v1606_v18 = vrot.slane %v1097_v47, 4 }
 0x150   :  { %2059 = vst.msk [vmem:[%s3267_s1 + $0xd8] sm:$0xff] %vm2031_vm7, %v2026_v38  ;;  %v984_v2 = vsel %vm909_vm5, %v981_v12, %v983_v50  ;;  %v1749_v4 = vrot.slane %v855_v51, 5  ;;  %v1750_v5 = vrot.slane %v856_v63, 5  ;;  %v1957_v40 = vrot.slane %v809_v52, 6 }
 0x151   :  { %v1051_v58 = vadd.f32 %v984_v2, %v810_v13  ;;  %v1463_v60 = vsel %vm764_vm4, %v1461_v8, %v1462_v9  ;;  %v1291_v32 = vadd.f32 %v1223_v20, %v1050_v17  ;;  %v1607_v7 = vsel %vm747_vm3, %v1605_v25, %v1606_v18 }
 0x152   :  { %v1958_v56 = vrot.slane %v810_v13, 6  ;;  %v1751_v55 = vsel %vm488_vm1, %v1749_v4, %v1750_v5  ;;  %v1098_v34 = vmul.f32 0.14759426, %v779_v45  ;;  %v1339_v53 = vmul.f32 0.1504663, %v779_v45 }
 0x153   :  { %v1752_v24 = vrot.slane %v857_v16, 5  ;;  %v1531_v10 = vadd.f32 %v1463_v60, %v1291_v32  ;;  %v1837_v42 = vmul.f32 0.13600498, %v779_v45  ;;  %v219_v57 = vmul.f32 0.1504663, %v3047_v43 }
 0x154   :  { %v1959_v62 = vsel %vm698_vm2, %v1957_v40, %v1958_v56  ;;  %v1224_v15 = vrot.slane %v1098_v34, 2  ;;  %v1464_v61 = vrot.slane %v1339_v53, 3  ;;  %v1608_v22 = vrot.slane %v1098_v34, 4 }
 0x155   :  { %v1753_v21 = vsel %vm488_vm1, %v1750_v5, %v1752_v24  ;;  %v1675_v28 = vadd.f32 %v1607_v7, %v1531_v10  ;;  %v1960_v44 = vrot.slane %v1837_v42, 6  ;;  %v250_v49 = vadd.f32 %v3161_v35, %v3158_v26 }
 0x156   :  { %v251_v14 = vadd.f32 %v219_v57, %v3171_v29  ;;  %v1225_v27 = vsel %vm1150_vm6, %v1222_v33, %v1224_v15  ;;  %v1465_v19 = vsel %vm764_vm4, %v1462_v9, %v1464_v61  ;;  %v1609_v54 = vsel %vm747_vm3, %v1606_v18, %v1608_v22 }
 0x157   :  { %v1819_v48 = vadd.f32 %v1751_v55, %v1675_v28  ;;  %v1292_v43 = vadd.f32 %v1225_v27, %v1051_v58  ;;  %v1961_v23 = vsel %vm698_vm2, %v1958_v56, %v1960_v44  ;;  %v284_v13 = vadd.f32 %v250_v49, %v3069_v41 }
 0x158   :  { %v285_v45 = vadd.f32 %v251_v14, %v3073_v59 }
 0x159   :  { %v2027_v52 = vadd.f32 %v1959_v62, %v1819_v48  ;;  %v1532_v51 = vadd.f32 %v1465_v19, %v1292_v43  ;;  %v320_v26 = vadd.f32 %v284_v13, %v2971_v3 }
 0x15a   :  { %v321_v35 = vadd.f32 %v285_v45, %v2977_v37 }
 0x15b   :  { %2060 = vst.msk [vmem:[%s3267_s1 + $0xe0] sm:$0xff] %vm2031_vm7, %v2027_v52  ;;  %v1676_v29 = vadd.f32 %v1609_v54, %v1532_v51  ;;  %v358_v63 = vadd.f32 %v320_v26, %v2873_v39 }
 0x15c   :  { %v359_v46 = vadd.f32 %v321_v35, %v2879_v1 }
 0x15d   :  { %v1820_v16 = vadd.f32 %v1753_v21, %v1676_v29  ;;  %v391_v41 = vrot.slane %v358_v63, 3  ;;  %v423_v36 = vrot.slane %v358_v63, 1  ;;  %v455_v59 = vrot.slane %v358_v63, 7 }
 0x15e   :  { %v534_v47 = vrot.slane %v358_v63, 5  ;;  %v535_v0 = vrot.slane %v359_v46, 5  ;;  %v600_v12 = vrot.slane %v359_v46, 3  ;;  %v632_v3 = vrot.slane %v359_v46, 1 }
 0x15f   :  { %v2028_v30 = vadd.f32 %v1961_v23, %v1820_v16  ;;  %v664_v37 = vrot.slane %v359_v46, 7  ;;  %v697_v11 = vsel %vm681_vm0, %v391_v41, %v423_v36 }
 0x160   :  { %v536_v38 = vsel %vm488_vm1, %v534_v47, %v535_v0  ;;  %v714_v50 = vsel %vm698_vm2, %v697_v11, %v455_v59  ;;  %v746_v39 = vsel %vm488_vm1, %v535_v0, %v600_v12 }
 0x161   :  { %2061 = vst.msk [vmem:[%s3267_s1 + $0xe8] sm:$0xff] %vm2031_vm7, %v2028_v30  ;;  %v730_v1 = vsel %vm488_vm1, %v714_v50, %v534_v47  ;;  %v763_v6 = vsel %vm747_vm3, %v746_v39, %v632_v3  ;;  %v859_v33 = vmul.f32 0.14116763, %v536_v38  ;;  %v1100_v20 = vmul.f32 0.14759426, %v536_v38 }
 0x162   :  { %v780_v31 = vsel %vm764_vm4, %v763_v6, %v664_v37  ;;  %v811_v8 = vmul.f32 0.13600498, %v730_v1  ;;  %v858_v9 = vmul.f32 0.14116763, %v730_v1  ;;  %v1099_v25 = vmul.f32 0.14759426, %v730_v1 }
 0x163   :  { %v860_v2 = vmul.f32 0.14116763, %v780_v31  ;;  %v986_v17 = vrot.slane %v859_v33, 1  ;;  %v1340_v60 = vmul.f32 0.1504663, %v730_v1  ;;  %v1227_v7 = vrot.slane %v1100_v20, 2 }
 0x164   :  { %v985_v18 = vrot.slane %v858_v9, 1  ;;  %v1226_v58 = vrot.slane %v1099_v25, 2  ;;  %v1341_v4 = vmul.f32 0.1504663, %v536_v38  ;;  %v812_v5 = vmul.f32 0.13600498, %v536_v38 }
 0x165   :  { %v988_v32 = vrot.slane %v860_v2, 1  ;;  %v1610_v40 = vrot.slane %v1099_v25, 4  ;;  %v1466_v55 = vrot.slane %v1340_v60, 3  ;;  %v1611_v53 = vrot.slane %v1100_v20, 4 }
 0x166   :  { %v987_v56 = vsel %vm909_vm5, %v985_v18, %v986_v17  ;;  %v1467_v34 = vrot.slane %v1341_v4, 3  ;;  %v1228_v62 = vsel %vm1150_vm6, %v1226_v58, %v1227_v7  ;;  %v1754_v57 = vrot.slane %v858_v9, 5 }
 0x167   :  { %v989_v24 = vsel %vm909_vm5, %v986_v17, %v988_v32  ;;  %v1052_v10 = vadd.f32 %v987_v56, %v811_v8  ;;  %v1755_v15 = vrot.slane %v859_v33, 5  ;;  %v1101_v22 = vmul.f32 0.14759426, %v780_v31 }
 0x168   :  { %v1468_v42 = vsel %vm764_vm4, %v1466_v55, %v1467_v34  ;;  %v1342_v21 = vmul.f32 0.1504663, %v780_v31  ;;  %v1053_v28 = vadd.f32 %v989_v24, %v812_v5  ;;  %v1612_v44 = vsel %vm747_vm3, %v1610_v40, %v1611_v53 }
 0x169   :  { %v1293_v61 = vadd.f32 %v1228_v62, %v1052_v10  ;;  %v1962_v49 = vrot.slane %v811_v8, 6  ;;  %v1963_v14 = vrot.slane %v812_v5, 6  ;;  %v1229_v19 = vrot.slane %v1101_v22, 2 }
 0x16a   :  { %v1469_v54 = vrot.slane %v1342_v21, 3  ;;  %v1838_v48 = vmul.f32 0.13600498, %v780_v31  ;;  %v1756_v43 = vsel %vm488_vm1, %v1754_v57, %v1755_v15  ;;  %v1613_v23 = vrot.slane %v1101_v22, 4 }
 0x16b   :  { %v1533_v27 = vadd.f32 %v1468_v42, %v1293_v61  ;;  %v1230_v45 = vsel %vm1150_vm6, %v1227_v7, %v1229_v19  ;;  %v1757_v51 = vrot.slane %v860_v2, 5  ;;  %v1964_v26 = vsel %vm698_vm2, %v1962_v49, %v1963_v14 }
 0x16c   :  { %v1470_v52 = vsel %vm764_vm4, %v1467_v34, %v1469_v54  ;;  %v1294_v35 = vadd.f32 %v1230_v45, %v1053_v28  ;;  %v1614_v63 = vsel %vm747_vm3, %v1611_v53, %v1613_v23  ;;  %v1965_v46 = vrot.slane %v1838_v48, 6 }
 0x16d   :  { %v1677_v13 = vadd.f32 %v1612_v44, %v1533_v27  ;;  %v1758_v36 = vsel %vm488_vm1, %v1755_v15, %v1757_v51 }
 0x16e   :  { %v1534_v16 = vadd.f32 %v1470_v52, %v1294_v35  ;;  %v1966_v47 = vsel %vm698_vm2, %v1963_v14, %v1965_v46 }
 0x16f   :  { %v1821_v29 = vadd.f32 %v1756_v43, %v1677_v13 }
 0x170   :  { %v1678_v59 = vadd.f32 %v1614_v63, %v1534_v16 }
 0x171   :  { %v2029_v41 = vadd.f32 %v1964_v26, %v1821_v29 }
 0x172   :  { %v1822_v0 = vadd.f32 %v1758_v36, %v1678_v59 }
 0x173   :  { %2062 = vst.msk [vmem:[%s3267_s1 + $0xf0] sm:$0xff] %vm2031_vm7, %v2029_v41 }
 0x174   :  { %v2030_v12 = vadd.f32 %v1966_v47, %v1822_v0 }
 0x176   :  { %2063 = vst.msk [vmem:[%s3267_s1 + $0xf8] sm:$0xff] %vm2031_vm7, %v2030_v12 }

</bundles_post_ra>
